<compile_context>
chip_gen: v7x
topology: tpu7x:2x2x1
jax: 0.10.0
libtpu: 0.0.40
codegen_flags: <defaults>
</compile_context>

<pallas_src>
import functools

import jax
import jax.numpy as jnp
from jax.experimental import pallas as pl
from jax.experimental.pallas import tpu as pltpu

SELU_ALPHA = 1.6732632423543772848170429916717
SELU_SCALE = 1.0507009873554804934193349852946
NEG_BIG = -1e30  # finite "-inf" used for running-max init (avoids inf-inf NaNs)


def _round_up(x, m):
    return ((x + m - 1) // m) * m


def _bf16_eup_ok():
    """bf16 transcendentals pay off on v6e/v7x EUPs; keep f32 elsewhere (v5e)."""
    try:
        kind = jax.devices()[0].device_kind.lower()
        return ("v6" in kind) or ("v7" in kind)
    except Exception:
        return False


def _selu(x, exp_bf16):
    # exp only matters on the negative branch; clamp so it can never overflow.
    xn = jnp.minimum(x, 0.0)
    if exp_bf16:
        e = jnp.exp(xn.astype(jnp.bfloat16)).astype(jnp.float32)
    else:
        e = jnp.exp(xn)
    return SELU_SCALE * jnp.where(x > 0, x, SELU_ALPHA * (e - 1.0))


# ----------------------------------------------------------------------------
# Pass 1: batch-tiled MLP + online (flash-style) global masked max / sum(exp).
# Grid = (2 cores, tiles_per_core); per-core partials merged in the wrapper.
# ----------------------------------------------------------------------------
def _make_pass1_kernel(exp_bf16):
    def kernel(x_ref, mask_ref, w1_ref, b1_ref, wh_ref, bh_ref, w5_ref, b5_ref,
               z_ref, gmax_ref, den_ref, m_scr, l_scr):
        step = pl.program_id(1)

        @pl.when(step == 0)
        def _():
            m_scr[...] = jnp.full_like(m_scr, NEG_BIG)
            l_scr[...] = jnp.zeros_like(l_scr)

        # 5-layer MLP: bf16 matmul operands, f32 MXU accumulation, f32 elementwise.
        h = jnp.dot(x_ref[...].astype(jnp.bfloat16), w1_ref[...],
                    preferred_element_type=jnp.float32) + b1_ref[...]
        h = _selu(h, exp_bf16)
        for i in range(3):  # three VMEM-resident (p_mid, p_mid) hidden layers
            h = jnp.dot(h.astype(jnp.bfloat16), wh_ref[i],
                        preferred_element_type=jnp.float32) + bh_ref[i]
            h = _selu(h, exp_bf16)
        z = jnp.dot(h.astype(jnp.bfloat16), w5_ref[...],
                    preferred_element_type=jnp.float32) + b5_ref[...]

        is_on = mask_ref[...] != 0

        # Store bf16 masked logits: -inf at unmasked / padded positions, so
        # pass 2 needs no mask (exp(-inf - gmax) == 0 exactly; -inf survives bf16).
        z_bf = jnp.where(is_on, z, -jnp.inf).astype(jnp.bfloat16)
        z_ref[...] = z_bf

        # Accumulate max / sum-of-exp from the *rounded* (bf16) values so the
        # denominator matches exactly what pass 2 will exponentiate.
        zr = jnp.where(is_on, z_bf.astype(jnp.float32), NEG_BIG)
        tile_max = jnp.max(zr, axis=(0, 1), keepdims=True)
        m_old = m_scr[...]
        m_new = jnp.maximum(m_old, tile_max)
        # zr - m_new <= 0 everywhere -> exp never overflows; where() kills the
        # exp(0)=1 of unmasked lanes in an all-off tile.
        tile_sum = jnp.sum(jnp.where(is_on, jnp.exp(zr - m_new), 0.0),
                           axis=(0, 1), keepdims=True)
        l_scr[...] = l_scr[...] * jnp.exp(m_old - m_new) + tile_sum
        m_scr[...] = m_new

        @pl.when(step == pl.num_programs(1) - 1)
        def _():
            gmax_ref[...] = jnp.broadcast_to(m_scr[...], gmax_ref.shape)
            den_ref[...] = jnp.broadcast_to(l_scr[...], den_ref.shape)

    return kernel


# ----------------------------------------------------------------------------
# Pass 2: elementwise rescale exp(z - gmax) * (1/denom); scalars live in SMEM.
# ----------------------------------------------------------------------------
def _pass2_kernel(s_ref, z_ref, out_ref):
    g = s_ref[0]      # global max
    inv = s_ref[1]    # 1 / global denom (exact division, computed once)
    out_ref[...] = jnp.exp(z_ref[...].astype(jnp.float32) - g) * inv


# ----------------------------------------------------------------------------
# One-time parameter preparation (pad hidden dims to 128, cast to bf16, stack).
# ----------------------------------------------------------------------------
def prepare_params(params):
    """params: 5 pairs (W, b) with W stored as (in_features, out_features)."""
    (w1, b1), (w2, b2), (w3, b3), (w4, b4), (w5, b5) = params
    n_in, n_mid = w1.shape
    n_out = w5.shape[1]
    p_mid = _round_up(n_mid, 128)

    def pad_w(w, rows, cols):
        out = jnp.zeros((rows, cols), jnp.float32)
        out = out.at[:w.shape[0], :w.shape[1]].set(w)
        return out.astype(jnp.bfloat16)

    def pad_b(b, cols):
        return jnp.zeros((1, cols), jnp.float32).at[0, :b.shape[0]].set(b)

    # Padding is exact: padded weight rows/cols and biases are zero, SELU(0)=0,
    # and padded mask entries are 0, so padding never contributes.
    return dict(
        w1=pad_w(w1, n_in, p_mid), b1=pad_b(b1, p_mid),
        wh=jnp.stack([pad_w(w, p_mid, p_mid) for w in (w2, w3, w4)]),
        bh=jnp.stack([pad_b(b, p_mid) for b in (b2, b3, b4)]),
        w5=pad_w(w5, p_mid, n_out), b5=pad_b(b5, n_out),
    )


# ----------------------------------------------------------------------------
# Forward wrapper
# ----------------------------------------------------------------------------
@functools.partial(jax.jit, static_argnames=("tile_b",))
def ffnn_forward(x, mask_bool, prep, *, tile_b=2048):
    """x: (B, n_in) f32, mask_bool: (B, n_out) bool, prep: prepare_params(...)."""
    B, n_in = x.shape
    p_mid = prep["w1"].shape[1]
    n_out = prep["w5"].shape[1]
    assert prep["w1"].shape[0] == n_in and mask_bool.shape == (B, n_out)

    # Batch tile: multiple of 32 (int8 sublane tiling), clamped near B.
    tile_b = max(32, min(_round_up(tile_b, 32), _round_up(B, 32)))
    n_cores = 2  # leading "parallel" axis -> both TensorCores on v7x
    pb = _round_up(B, n_cores * tile_b)
    tiles_per_core = pb // (n_cores * tile_b)

    if pb == B:
        x_p = x.astype(jnp.float32)
        mask_p = mask_bool.astype(jnp.int8)
    else:
        x_p = jnp.zeros((pb, n_in), jnp.float32).at[:B].set(x)
        mask_p = jnp.zeros((pb, n_out), jnp.int8).at[:B].set(
            mask_bool.astype(jnp.int8))

    exp_bf16 = _bf16_eup_ok()

    flops = 2 * pb * (n_in * p_mid + 3 * p_mid * p_mid + p_mid * n_out)
    transcendentals = pb * (4 * p_mid + 2 * n_out)
    bytes_accessed = (x_p.size * 4 + mask_p.size
                      + (prep["w1"].size + prep["wh"].size + prep["w5"].size) * 2
                      + (prep["b1"].size + prep["bh"].size + prep["b5"].size) * 4
                      + pb * n_out * 2 + 2 * n_cores * 8 * 128 * 4)

    z_full, gmax_pc, den_pc = pl.pallas_call(
        _make_pass1_kernel(exp_bf16),
        out_shape=(
            jax.ShapeDtypeStruct((pb, n_out), jnp.bfloat16),         # masked logits
            jax.ShapeDtypeStruct((n_cores, 8, 128), jnp.float32),    # per-core gmax
            jax.ShapeDtypeStruct((n_cores, 8, 128), jnp.float32),    # per-core denom
        ),
        grid_spec=pltpu.PrefetchScalarGridSpec(
            num_scalar_prefetch=0,
            grid=(n_cores, tiles_per_core),
            in_specs=[
                pl.BlockSpec((tile_b, n_in),
                             lambda c, i: (c * tiles_per_core + i, 0)),   # x tile
                pl.BlockSpec((tile_b, n_out),
                             lambda c, i: (c * tiles_per_core + i, 0)),   # mask tile
                pl.BlockSpec((n_in, p_mid), lambda c, i: (0, 0)),         # W1 (resident)
                pl.BlockSpec((1, p_mid), lambda c, i: (0, 0)),            # b1
                pl.BlockSpec((3, p_mid, p_mid), lambda c, i: (0, 0, 0)),  # W2..W4
                pl.BlockSpec((3, 1, p_mid), lambda c, i: (0, 0, 0)),      # b2..b4
                pl.BlockSpec((p_mid, n_out), lambda c, i: (0, 0)),        # W5
                pl.BlockSpec((1, n_out), lambda c, i: (0, 0)),            # b5
            ],
            out_specs=[
                pl.BlockSpec((tile_b, n_out),
                             lambda c, i: (c * tiles_per_core + i, 0)),
                pl.BlockSpec((1, 8, 128), lambda c, i: (c, 0, 0)),
                pl.BlockSpec((1, 8, 128), lambda c, i: (c, 0, 0)),
            ],
            scratch_shapes=[pltpu.VMEM((1, 1), jnp.float32),
                            pltpu.VMEM((1, 1), jnp.float32)],
        ),
        compiler_params=pltpu.CompilerParams(
            dimension_semantics=("parallel", "arbitrary")),
        cost_estimate=pl.CostEstimate(flops=flops,
                                      transcendentals=transcendentals,
                                      bytes_accessed=bytes_accessed),
    )(x_p, mask_p, prep["w1"], prep["b1"], prep["wh"], prep["bh"],
      prep["w5"], prep["b5"])

    # Log-sum-exp merge of the two per-core partials; exact reciprocal, hoisted.
    g_pc = gmax_pc[:, 0, 0]
    d_pc = den_pc[:, 0, 0]
    g = jnp.max(g_pc)
    denom = jnp.sum(d_pc * jnp.exp(g_pc - g))
    inv = 1.0 / jnp.maximum(denom, 1e-30)
    scalars = jnp.stack([g, inv]).astype(jnp.float32)  # (2,) -> SMEM

    # Pass 2 is pure elementwise: use one big lane block when it fits VMEM.
    if pb * n_out * (2 + 4) * 2 <= (16 << 20):
        tile2 = pb
    else:
        tile2 = tile_b
    out_full = pl.pallas_call(
        _pass2_kernel,
        out_shape=jax.ShapeDtypeStruct((pb, n_out), jnp.float32),
        grid_spec=pltpu.PrefetchScalarGridSpec(
            num_scalar_prefetch=0,
            grid=(pb // tile2,),
            in_specs=[
                pl.BlockSpec(memory_space=pltpu.MemorySpace.SMEM),  # [gmax, 1/denom]
                pl.BlockSpec((tile2, n_out), lambda i: (i, 0)),
            ],
            out_specs=pl.BlockSpec((tile2, n_out), lambda i: (i, 0)),
        ),
        compiler_params=pltpu.CompilerParams(
            dimension_semantics=("parallel",)),
    )(scalars, z_full)

    return out_full[:B] if pb != B else out_full


# ----------------------------------------------------------------------------
# Pure-JAX reference (same bf16-matmul / f32-elementwise recipe)
# ----------------------------------------------------------------------------
def _reference_forward(x, mask_bool, params):
    h = x
    for (w, b) in params[:-1]:
        h = _selu(jnp.dot(h.astype(jnp.bfloat16), w.astype(jnp.bfloat16),
                          preferred_element_type=jnp.float32) + b, False)
    w, b = params[-1]
    z = jnp.dot(h.astype(jnp.bfloat16), w.astype(jnp.bfloat16),
                preferred_element_type=jnp.float32) + b
    z = z * mask_bool.astype(jnp.float32)
    gmax = jnp.max(jnp.where(mask_bool, z, NEG_BIG))
    e = jnp.where(mask_bool, jnp.exp(z - gmax), 0.0)
    denom = jnp.maximum(jnp.sum(e), 1e-30)
    return jnp.where(mask_bool, e / denom, 0.0)


def init_params(key, n_in, n_mid, n_out):
    """PyTorch-Linear-like init: U(-1/sqrt(fan_in), 1/sqrt(fan_in))."""
    dims = [(n_in, n_mid), (n_mid, n_mid), (n_mid, n_mid),
            (n_mid, n_mid), (n_mid, n_out)]
    params = []
    for (fi, fo) in dims:
        key, kw, kb = jax.random.split(key, 3)
        bound = 1.0 / jnp.sqrt(jnp.float32(fi))
        w = jax.random.uniform(kw, (fi, fo), jnp.float32, -bound, bound)
        b = jax.random.uniform(kb, (fo,), jnp.float32, -bound, bound)
        params.append((w, b))
    return params


if __name__ == "__main__":
    n_in, n_mid, n_out = 16, 32, 8
    params = init_params(jax.random.PRNGKey(42), n_in, n_mid, n_out)
    prep = prepare_params(params)          # pad/stack/cast weights ONCE

    key = jax.random.PRNGKey(0)
    key, kx, km = jax.random.split(key, 3)

    # --- small demo shape (one tile per core) ------------------------------
    B = 2
    x = jax.random.normal(kx, (B, n_in), jnp.float32)
    mask = jax.random.bernoulli(km, 0.5, (B, n_out))
    mask = mask.at[0, 0].set(True)  # guarantee >= 1 masked element

    out = jax.block_until_ready(ffnn_forward(x, mask, prep, tile_b=32))
    assert out.shape == (B, n_out)
    assert abs(float(jnp.sum(out)) - 1.0) < 1e-2              # single global softmax
    assert float(jnp.max(jnp.abs(jnp.where(mask, 0.0, out)))) == 0.0

    # --- multi-tile path (2 x 3 grid) vs. pure-JAX reference ---------------
    B2 = 300
    key, kx2, km2 = jax.random.split(key, 3)
    x2 = jax.random.normal(kx2, (B2, n_in), jnp.float32)
    mask2 = jax.random.bernoulli(km2, 0.5, (B2, n_out))
    mask2 = mask2.at[0, 0].set(True)

    out2 = jax.block_until_ready(ffnn_forward(x2, mask2, prep, tile_b=64))
    ref2 = _reference_forward(x2, mask2, params)
    assert abs(float(jnp.sum(out2)) - 1.0) < 1e-2
    assert float(jnp.max(jnp.abs(jnp.where(mask2, 0.0, out2)))) == 0.0
    assert (float(jnp.max(jnp.abs(out2 - ref2)))
            < 5e-2 * float(jnp.max(ref2)) + 1e-6)

    print("KERNEL_OK")
</pallas_src>

<mosaic_0001>
module attributes {stable_mosaic.version = 11 : i64} {
  func.func @kernel(%arg0: i32, %arg1: i32, %arg2: memref<32x16xf32, #tpu.memory_space<vmem>>, %arg3: memref<32x8xi8, #tpu.memory_space<vmem>>, %arg4: memref<16x128xbf16, #tpu.memory_space<vmem>>, %arg5: memref<1x128xf32, #tpu.memory_space<vmem>>, %arg6: memref<3x128x128xbf16, #tpu.memory_space<vmem>>, %arg7: memref<3x1x128xf32, #tpu.memory_space<vmem>>, %arg8: memref<128x8xbf16, #tpu.memory_space<vmem>>, %arg9: memref<1x8xf32, #tpu.memory_space<vmem>>, %arg10: memref<32x8xbf16, #tpu.memory_space<vmem>>, %arg11: memref<1x8x128xf32, #tpu.memory_space<vmem>>, %arg12: memref<1x8x128xf32, #tpu.memory_space<vmem>>, %arg13: memref<1x1xf32, #tpu.memory_space<vmem>>, %arg14: memref<1x1xf32, #tpu.memory_space<vmem>>) attributes {dimension_semantics = [#tpu.dimension_semantics<parallel>, #tpu.dimension_semantics<arbitrary>], iteration_bounds = array<i64: 2, 1>, scalar_prefetch = 0 : i64, scratch_operands = 2 : i64, tpu.core_type = #tpu.core_type<tc>, window_params = [{transform_indices = @transform_0, window_bounds = array<i64: 32, 16>}, {transform_indices = @transform_1, window_bounds = array<i64: 32, 8>}, {pipeline_mode = #tpu.pipeline_mode<synchronous>, transform_indices = @transform_2, window_bounds = array<i64: 16, 128>}, {pipeline_mode = #tpu.pipeline_mode<synchronous>, transform_indices = @transform_3, window_bounds = array<i64: 1, 128>}, {pipeline_mode = #tpu.pipeline_mode<synchronous>, transform_indices = @transform_4, window_bounds = array<i64: 3, 128, 128>}, {pipeline_mode = #tpu.pipeline_mode<synchronous>, transform_indices = @transform_5, window_bounds = array<i64: 3, 1, 128>}, {pipeline_mode = #tpu.pipeline_mode<synchronous>, transform_indices = @transform_6, window_bounds = array<i64: 128, 8>}, {pipeline_mode = #tpu.pipeline_mode<synchronous>, transform_indices = @transform_7, window_bounds = array<i64: 1, 8>}, {transform_indices = @transform_8, window_bounds = array<i64: 32, 8>}, {transform_indices = @transform_9, window_bounds = array<i64: 1, 8, 128>}, {transform_indices = @transform_10, window_bounds = array<i64: 1, 8, 128>}]} {
    %c0_i32 = arith.constant 0 : i32
    %0 = arith.cmpi eq, %arg1, %c0_i32 : i32
    %1 = arith.extui %0 : i1 to i32
    %c0_i32_0 = arith.constant 0 : i32
    %2 = arith.cmpi ne, %1, %c0_i32_0 : i32
    scf.if %2 {
      %cst_69 = arith.constant -1.000000e+30 : f32
      %125 = vector.broadcast %cst_69 : f32 to vector<1x1xf32>
      %c0_70 = arith.constant 0 : index
      %c0_71 = arith.constant 0 : index
      %126 = vector.load %arg13[%c0_70, %c0_71] : memref<1x1xf32, #tpu.memory_space<vmem>>, vector<1x1xf32>
      tpu.vector_store %arg13[%c0_70, %c0_71], %125 {strides = array<i32>} : memref<1x1xf32, #tpu.memory_space<vmem>>, vector<1x1xf32>,
      %cst_72 = arith.constant 0.000000e+00 : f32
      %127 = vector.broadcast %cst_72 : f32 to vector<1x1xf32>
      %c0_73 = arith.constant 0 : index
      %c0_74 = arith.constant 0 : index
      %128 = vector.load %arg14[%c0_73, %c0_74] : memref<1x1xf32, #tpu.memory_space<vmem>>, vector<1x1xf32>
      tpu.vector_store %arg14[%c0_73, %c0_74], %127 {strides = array<i32>} : memref<1x1xf32, #tpu.memory_space<vmem>>, vector<1x1xf32>,
    } else {
    }
    %c0 = arith.constant 0 : index
    %c0_1 = arith.constant 0 : index
    %3 = vector.load %arg2[%c0, %c0_1] : memref<32x16xf32, #tpu.memory_space<vmem>>, vector<32x16xf32>
    %4 = arith.truncf %3 : vector<32x16xf32> to vector<32x16xbf16>
    %c0_2 = arith.constant 0 : index
    %c0_3 = arith.constant 0 : index
    %5 = vector.load %arg4[%c0_2, %c0_3] : memref<16x128xbf16, #tpu.memory_space<vmem>>, vector<16x128xbf16>
    %cst = arith.constant dense<0.000000e+00> : vector<32x128xf32>
    %6 = tpu.matmul %4, %5, %cst {dimension_numbers = #tpu.dot_dimension_numbers<[1], [0], [0], [1], [0, 0, 1, 1], [], []>} : vector<32x16xbf16>, vector<16x128xbf16>, vector<32x128xf32> -> vector<32x128xf32>
    %c0_4 = arith.constant 0 : index
    %c0_5 = arith.constant 0 : index
    %7 = vector.load %arg5[%c0_4, %c0_5] : memref<1x128xf32, #tpu.memory_space<vmem>>, vector<1x128xf32>
    %8 = vector.broadcast %7 : vector<1x128xf32> to vector<32x128xf32>
    %9 = arith.addf %6, %8 : vector<32x128xf32>
    %cst_6 = arith.constant 0.000000e+00 : f32
    %10 = vector.broadcast %cst_6 : f32 to vector<32x128xf32>
    %11 = arith.minimumf %9, %10 : vector<32x128xf32>
    %12 = math.exp %11 : vector<32x128xf32>
    %cst_7 = arith.constant 0.000000e+00 : f32
    %13 = vector.broadcast %cst_7 : f32 to vector<32x128xf32>
    %14 = arith.cmpf ogt, %9, %13 : vector<32x128xf32>
    %cst_8 = arith.constant 1.000000e+00 : f32
    %15 = vector.broadcast %cst_8 : f32 to vector<32x128xf32>
    %16 = arith.subf %12, %15 : vector<32x128xf32>
    %cst_9 = arith.constant 1.67326319 : f32
    %17 = vector.broadcast %cst_9 : f32 to vector<32x128xf32>
    %18 = arith.mulf %17, %16 : vector<32x128xf32>
    %19 = arith.select %14, %9, %18 : vector<32x128xi1>, vector<32x128xf32>
    %cst_10 = arith.constant 1.05070102 : f32
    %20 = vector.broadcast %cst_10 : f32 to vector<32x128xf32>
    %21 = arith.mulf %20, %19 : vector<32x128xf32>
    %22 = arith.truncf %21 : vector<32x128xf32> to vector<32x128xbf16>
    %c0_11 = arith.constant 0 : index
    %c0_12 = arith.constant 0 : index
    %c0_13 = arith.constant 0 : index
    %23 = vector.load %arg6[%c0_11, %c0_12, %c0_13] : memref<3x128x128xbf16, #tpu.memory_space<vmem>>, vector<1x128x128xbf16>
    %24 = vector.shape_cast %23 : vector<1x128x128xbf16> to vector<128x128xbf16>
    %cst_14 = arith.constant dense<0.000000e+00> : vector<32x128xf32>
    %25 = tpu.matmul %22, %24, %cst_14 {dimension_numbers = #tpu.dot_dimension_numbers<[1], [0], [0], [1], [0, 0, 1, 1], [], []>} : vector<32x128xbf16>, vector<128x128xbf16>, vector<32x128xf32> -> vector<32x128xf32>
    %c0_15 = arith.constant 0 : index
    %c0_16 = arith.constant 0 : index
    %c0_17 = arith.constant 0 : index
    %26 = vector.load %arg7[%c0_15, %c0_16, %c0_17] : memref<3x1x128xf32, #tpu.memory_space<vmem>>, vector<1x1x128xf32>
    %27 = vector.shape_cast %26 : vector<1x1x128xf32> to vector<1x128xf32>
    %28 = vector.broadcast %27 : vector<1x128xf32> to vector<32x128xf32>
    %29 = arith.addf %25, %28 : vector<32x128xf32>
    %cst_18 = arith.constant 0.000000e+00 : f32
    %30 = vector.broadcast %cst_18 : f32 to vector<32x128xf32>
    %31 = arith.minimumf %29, %30 : vector<32x128xf32>
    %32 = math.exp %31 : vector<32x128xf32>
    %cst_19 = arith.constant 0.000000e+00 : f32
    %33 = vector.broadcast %cst_19 : f32 to vector<32x128xf32>
    %34 = arith.cmpf ogt, %29, %33 : vector<32x128xf32>
    %cst_20 = arith.constant 1.000000e+00 : f32
    %35 = vector.broadcast %cst_20 : f32 to vector<32x128xf32>
    %36 = arith.subf %32, %35 : vector<32x128xf32>
    %cst_21 = arith.constant 1.67326319 : f32
    %37 = vector.broadcast %cst_21 : f32 to vector<32x128xf32>
    %38 = arith.mulf %37, %36 : vector<32x128xf32>
    %39 = arith.select %34, %29, %38 : vector<32x128xi1>, vector<32x128xf32>
    %cst_22 = arith.constant 1.05070102 : f32
    %40 = vector.broadcast %cst_22 : f32 to vector<32x128xf32>
    %41 = arith.mulf %40, %39 : vector<32x128xf32>
    %42 = arith.truncf %41 : vector<32x128xf32> to vector<32x128xbf16>
    %c1 = arith.constant 1 : index
    %c0_23 = arith.constant 0 : index
    %c0_24 = arith.constant 0 : index
    %43 = vector.load %arg6[%c1, %c0_23, %c0_24] : memref<3x128x128xbf16, #tpu.memory_space<vmem>>, vector<1x128x128xbf16>
    %44 = vector.shape_cast %43 : vector<1x128x128xbf16> to vector<128x128xbf16>
    %cst_25 = arith.constant dense<0.000000e+00> : vector<32x128xf32>
    %45 = tpu.matmul %42, %44, %cst_25 {dimension_numbers = #tpu.dot_dimension_numbers<[1], [0], [0], [1], [0, 0, 1, 1], [], []>} : vector<32x128xbf16>, vector<128x128xbf16>, vector<32x128xf32> -> vector<32x128xf32>
    %c1_26 = arith.constant 1 : index
    %c0_27 = arith.constant 0 : index
    %c0_28 = arith.constant 0 : index
    %46 = vector.load %arg7[%c1_26, %c0_27, %c0_28] : memref<3x1x128xf32, #tpu.memory_space<vmem>>, vector<1x1x128xf32>
    %47 = vector.shape_cast %46 : vector<1x1x128xf32> to vector<1x128xf32>
    %48 = vector.broadcast %47 : vector<1x128xf32> to vector<32x128xf32>
    %49 = arith.addf %45, %48 : vector<32x128xf32>
    %cst_29 = arith.constant 0.000000e+00 : f32
    %50 = vector.broadcast %cst_29 : f32 to vector<32x128xf32>
    %51 = arith.minimumf %49, %50 : vector<32x128xf32>
    %52 = math.exp %51 : vector<32x128xf32>
    %cst_30 = arith.constant 0.000000e+00 : f32
    %53 = vector.broadcast %cst_30 : f32 to vector<32x128xf32>
    %54 = arith.cmpf ogt, %49, %53 : vector<32x128xf32>
    %cst_31 = arith.constant 1.000000e+00 : f32
    %55 = vector.broadcast %cst_31 : f32 to vector<32x128xf32>
    %56 = arith.subf %52, %55 : vector<32x128xf32>
    %cst_32 = arith.constant 1.67326319 : f32
    %57 = vector.broadcast %cst_32 : f32 to vector<32x128xf32>
    %58 = arith.mulf %57, %56 : vector<32x128xf32>
    %59 = arith.select %54, %49, %58 : vector<32x128xi1>, vector<32x128xf32>
    %cst_33 = arith.constant 1.05070102 : f32
    %60 = vector.broadcast %cst_33 : f32 to vector<32x128xf32>
    %61 = arith.mulf %60, %59 : vector<32x128xf32>
    %62 = arith.truncf %61 : vector<32x128xf32> to vector<32x128xbf16>
    %c2 = arith.constant 2 : index
    %c0_34 = arith.constant 0 : index
    %c0_35 = arith.constant 0 : index
    %63 = vector.load %arg6[%c2, %c0_34, %c0_35] : memref<3x128x128xbf16, #tpu.memory_space<vmem>>, vector<1x128x128xbf16>
    %64 = vector.shape_cast %63 : vector<1x128x128xbf16> to vector<128x128xbf16>
    %cst_36 = arith.constant dense<0.000000e+00> : vector<32x128xf32>
    %65 = tpu.matmul %62, %64, %cst_36 {dimension_numbers = #tpu.dot_dimension_numbers<[1], [0], [0], [1], [0, 0, 1, 1], [], []>} : vector<32x128xbf16>, vector<128x128xbf16>, vector<32x128xf32> -> vector<32x128xf32>
    %c2_37 = arith.constant 2 : index
    %c0_38 = arith.constant 0 : index
    %c0_39 = arith.constant 0 : index
    %66 = vector.load %arg7[%c2_37, %c0_38, %c0_39] : memref<3x1x128xf32, #tpu.memory_space<vmem>>, vector<1x1x128xf32>
    %67 = vector.shape_cast %66 : vector<1x1x128xf32> to vector<1x128xf32>
    %68 = vector.broadcast %67 : vector<1x128xf32> to vector<32x128xf32>
    %69 = arith.addf %65, %68 : vector<32x128xf32>
    %cst_40 = arith.constant 0.000000e+00 : f32
    %70 = vector.broadcast %cst_40 : f32 to vector<32x128xf32>
    %71 = arith.minimumf %69, %70 : vector<32x128xf32>
    %72 = math.exp %71 : vector<32x128xf32>
    %cst_41 = arith.constant 0.000000e+00 : f32
    %73 = vector.broadcast %cst_41 : f32 to vector<32x128xf32>
    %74 = arith.cmpf ogt, %69, %73 : vector<32x128xf32>
    %cst_42 = arith.constant 1.000000e+00 : f32
    %75 = vector.broadcast %cst_42 : f32 to vector<32x128xf32>
    %76 = arith.subf %72, %75 : vector<32x128xf32>
    %cst_43 = arith.constant 1.67326319 : f32
    %77 = vector.broadcast %cst_43 : f32 to vector<32x128xf32>
    %78 = arith.mulf %77, %76 : vector<32x128xf32>
    %79 = arith.select %74, %69, %78 : vector<32x128xi1>, vector<32x128xf32>
    %cst_44 = arith.constant 1.05070102 : f32
    %80 = vector.broadcast %cst_44 : f32 to vector<32x128xf32>
    %81 = arith.mulf %80, %79 : vector<32x128xf32>
    %82 = arith.truncf %81 : vector<32x128xf32> to vector<32x128xbf16>
    %c0_45 = arith.constant 0 : index
    %c0_46 = arith.constant 0 : index
    %83 = vector.load %arg8[%c0_45, %c0_46] : memref<128x8xbf16, #tpu.memory_space<vmem>>, vector<128x8xbf16>
    %cst_47 = arith.constant dense<0.000000e+00> : vector<32x8xf32>
    %84 = tpu.matmul %82, %83, %cst_47 {dimension_numbers = #tpu.dot_dimension_numbers<[1], [0], [0], [1], [0, 0, 1, 1], [], []>} : vector<32x128xbf16>, vector<128x8xbf16>, vector<32x8xf32> -> vector<32x8xf32>
    %c0_48 = arith.constant 0 : index
    %c0_49 = arith.constant 0 : index
    %85 = vector.load %arg9[%c0_48, %c0_49] : memref<1x8xf32, #tpu.memory_space<vmem>>, vector<1x8xf32>
    %86 = vector.broadcast %85 : vector<1x8xf32> to vector<32x8xf32>
    %87 = arith.addf %84, %86 : vector<32x8xf32>
    %c0_50 = arith.constant 0 : index
    %c0_51 = arith.constant 0 : index
    %88 = vector.load %arg3[%c0_50, %c0_51] : memref<32x8xi8, #tpu.memory_space<vmem>>, vector<32x8xi8>
    %c0_i8 = arith.constant 0 : i8
    %89 = vector.broadcast %c0_i8 : i8 to vector<32x8xi8>
    %90 = arith.cmpi ne, %88, %89 : vector<32x8xi8>
    %cst_52 = arith.constant 0xFF800000 : f32
    %91 = vector.broadcast %cst_52 : f32 to vector<32x8xf32>
    %92 = arith.select %90, %87, %91 : vector<32x8xi1>, vector<32x8xf32>
    %93 = arith.truncf %92 : vector<32x8xf32> to vector<32x8xbf16>
    %c0_53 = arith.constant 0 : index
    %c0_54 = arith.constant 0 : index
    %94 = vector.load %arg10[%c0_53, %c0_54] : memref<32x8xbf16, #tpu.memory_space<vmem>>, vector<32x8xbf16>
    tpu.vector_store %arg10[%c0_53, %c0_54], %93 {strides = array<i32>} : memref<32x8xbf16, #tpu.memory_space<vmem>>, vector<32x8xbf16>,
    %95 = arith.extf %93 : vector<32x8xbf16> to vector<32x8xf32>
    %cst_55 = arith.constant -1.000000e+30 : f32
    %96 = vector.broadcast %cst_55 : f32 to vector<32x8xf32>
    %97 = arith.select %90, %95, %96 : vector<32x8xi1>, vector<32x8xf32>
    %98 = vector.shape_cast %97 : vector<32x8xf32> to vector<1x32x8xf32>
    %cst_56 = arith.constant dense<0xFF800000> : vector<1xf32>
    %99 = vector.multi_reduction <maximumf>, %98, %cst_56 [1, 2] : vector<1x32x8xf32> to vector<1xf32>
    %100 = vector.shape_cast %99 : vector<1xf32> to vector<1x1x1xf32>
    %101 = vector.extract %100[0, 0, 0] : f32 from vector<1x1x1xf32>
    %102 = vector.broadcast %101 : f32 to vector<1x1xf32>
    %c0_57 = arith.constant 0 : index
    %c0_58 = arith.constant 0 : index
    %103 = vector.load %arg13[%c0_57, %c0_58] : memref<1x1xf32, #tpu.memory_space<vmem>>, vector<1x1xf32>
    %104 = arith.maximumf %103, %102 : vector<1x1xf32>
    %105 = vector.broadcast %104 : vector<1x1xf32> to vector<32x8xf32>
    %106 = arith.subf %97, %105 : vector<32x8xf32>
    %107 = math.exp %106 : vector<32x8xf32>
    %cst_59 = arith.constant 0.000000e+00 : f32
    %108 = vector.broadcast %cst_59 : f32 to vector<32x8xf32>
    %109 = arith.select %90, %107, %108 : vector<32x8xi1>, vector<32x8xf32>
    %110 = vector.shape_cast %109 : vector<32x8xf32> to vector<1x32x8xf32>
    %cst_60 = arith.constant dense<0.000000e+00> : vector<1xf32>
    %111 = vector.multi_reduction <add>, %110, %cst_60 [1, 2] : vector<1x32x8xf32> to vector<1xf32>
    %112 = vector.shape_cast %111 : vector<1xf32> to vector<1x1x1xf32>
    %113 = vector.extract %112[0, 0, 0] : f32 from vector<1x1x1xf32>
    %114 = vector.broadcast %113 : f32 to vector<1x1xf32>
    %c0_61 = arith.constant 0 : index
    %c0_62 = arith.constant 0 : index
    %115 = vector.load %arg14[%c0_61, %c0_62] : memref<1x1xf32, #tpu.memory_space<vmem>>, vector<1x1xf32>
    %116 = arith.subf %103, %104 : vector<1x1xf32>
    %117 = math.exp %116 : vector<1x1xf32>
    %118 = arith.mulf %115, %117 : vector<1x1xf32>
    %119 = arith.addf %118, %114 : vector<1x1xf32>
    %c0_63 = arith.constant 0 : index
    %c0_64 = arith.constant 0 : index
    %120 = vector.load %arg14[%c0_63, %c0_64] : memref<1x1xf32, #tpu.memory_space<vmem>>, vector<1x1xf32>
    tpu.vector_store %arg14[%c0_63, %c0_64], %119 {strides = array<i32>} : memref<1x1xf32, #tpu.memory_space<vmem>>, vector<1x1xf32>,
    %c0_65 = arith.constant 0 : index
    %c0_66 = arith.constant 0 : index
    %121 = vector.load %arg13[%c0_65, %c0_66] : memref<1x1xf32, #tpu.memory_space<vmem>>, vector<1x1xf32>
    tpu.vector_store %arg13[%c0_65, %c0_66], %104 {strides = array<i32>} : memref<1x1xf32, #tpu.memory_space<vmem>>, vector<1x1xf32>,
    %c0_i32_67 = arith.constant 0 : i32
    %122 = arith.cmpi eq, %arg1, %c0_i32_67 : i32
    %123 = arith.extui %122 : i1 to i32
    %c0_i32_68 = arith.constant 0 : i32
    %124 = arith.cmpi ne, %123, %c0_i32_68 : i32
    scf.if %124 {
      %c0_69 = arith.constant 0 : index
      %c0_70 = arith.constant 0 : index
      %125 = vector.load %arg13[%c0_69, %c0_70] : memref<1x1xf32, #tpu.memory_space<vmem>>, vector<1x1xf32>
      %126 = vector.shape_cast %125 : vector<1x1xf32> to vector<1x1x1xf32>
      %127 = vector.broadcast %126 : vector<1x1x1xf32> to vector<1x8x128xf32>
      %c0_71 = arith.constant 0 : index
      %c0_72 = arith.constant 0 : index
      %c0_73 = arith.constant 0 : index
      %128 = vector.load %arg11[%c0_71, %c0_72, %c0_73] : memref<1x8x128xf32, #tpu.memory_space<vmem>>, vector<1x8x128xf32>
      tpu.vector_store %arg11[%c0_71, %c0_72, %c0_73], %127 {strides = array<i32>} : memref<1x8x128xf32, #tpu.memory_space<vmem>>, vector<1x8x128xf32>,
      %c0_74 = arith.constant 0 : index
      %c0_75 = arith.constant 0 : index
      %129 = vector.load %arg14[%c0_74, %c0_75] : memref<1x1xf32, #tpu.memory_space<vmem>>, vector<1x1xf32>
      %130 = vector.shape_cast %129 : vector<1x1xf32> to vector<1x1x1xf32>
      %131 = vector.broadcast %130 : vector<1x1x1xf32> to vector<1x8x128xf32>
      %c0_76 = arith.constant 0 : index
      %c0_77 = arith.constant 0 : index
      %c0_78 = arith.constant 0 : index
      %132 = vector.load %arg12[%c0_76, %c0_77, %c0_78] : memref<1x8x128xf32, #tpu.memory_space<vmem>>, vector<1x8x128xf32>
      tpu.vector_store %arg12[%c0_76, %c0_77, %c0_78], %131 {strides = array<i32>} : memref<1x8x128xf32, #tpu.memory_space<vmem>>, vector<1x8x128xf32>,
    } else {
    }
    return
  }
  func.func @transform_0(%arg0: i32, %arg1: i32) -> (i32, i32) {
    %c1_i32 = arith.constant 1 : i32
    %0 = arith.muli %arg0, %c1_i32 : i32
    %1 = arith.addi %0, %arg1 : i32
    %c0_i32 = arith.constant 0 : i32
    %c0_i32_0 = arith.constant 0 : i32
    return %1, %c0_i32 : i32, i32
  }
  func.func @transform_1(%arg0: i32, %arg1: i32) -> (i32, i32) {
    %c1_i32 = arith.constant 1 : i32
    %0 = arith.muli %arg0, %c1_i32 : i32
    %1 = arith.addi %0, %arg1 : i32
    %c0_i32 = arith.constant 0 : i32
    %c0_i32_0 = arith.constant 0 : i32
    return %1, %c0_i32 : i32, i32
  }
  func.func @transform_2(%arg0: i32, %arg1: i32) -> (i32, i32) {
    %c0_i32 = arith.constant 0 : i32
    %c0_i32_0 = arith.constant 0 : i32
    %c0_i32_1 = arith.constant 0 : i32
    return %c0_i32, %c0_i32_0 : i32, i32
  }
  func.func @transform_3(%arg0: i32, %arg1: i32) -> (i32, i32) {
    %c0_i32 = arith.constant 0 : i32
    %c0_i32_0 = arith.constant 0 : i32
    %c0_i32_1 = arith.constant 0 : i32
    return %c0_i32, %c0_i32_0 : i32, i32
  }
  func.func @transform_4(%arg0: i32, %arg1: i32) -> (i32, i32, i32) {
    %c0_i32 = arith.constant 0 : i32
    %c0_i32_0 = arith.constant 0 : i32
    %c0_i32_1 = arith.constant 0 : i32
    %c0_i32_2 = arith.constant 0 : i32
    return %c0_i32, %c0_i32_0, %c0_i32_1 : i32, i32, i32
  }
  func.func @transform_5(%arg0: i32, %arg1: i32) -> (i32, i32, i32) {
    %c0_i32 = arith.constant 0 : i32
    %c0_i32_0 = arith.constant 0 : i32
    %c0_i32_1 = arith.constant 0 : i32
    %c0_i32_2 = arith.constant 0 : i32
    return %c0_i32, %c0_i32_0, %c0_i32_1 : i32, i32, i32
  }
  func.func @transform_6(%arg0: i32, %arg1: i32) -> (i32, i32) {
    %c0_i32 = arith.constant 0 : i32
    %c0_i32_0 = arith.constant 0 : i32
    %c0_i32_1 = arith.constant 0 : i32
    return %c0_i32, %c0_i32_0 : i32, i32
  }
  func.func @transform_7(%arg0: i32, %arg1: i32) -> (i32, i32) {
    %c0_i32 = arith.constant 0 : i32
    %c0_i32_0 = arith.constant 0 : i32
    %c0_i32_1 = arith.constant 0 : i32
    return %c0_i32, %c0_i32_0 : i32, i32
  }
  func.func @transform_8(%arg0: i32, %arg1: i32) -> (i32, i32) {
    %c1_i32 = arith.constant 1 : i32
    %0 = arith.muli %arg0, %c1_i32 : i32
    %1 = arith.addi %0, %arg1 : i32
    %c0_i32 = arith.constant 0 : i32
    %c0_i32_0 = arith.constant 0 : i32
    return %1, %c0_i32 : i32, i32
  }
  func.func @transform_9(%arg0: i32, %arg1: i32) -> (i32, i32, i32) {
    %c0_i32 = arith.constant 0 : i32
    %c0_i32_0 = arith.constant 0 : i32
    %c0_i32_1 = arith.constant 0 : i32
    return %arg0, %c0_i32, %c0_i32_0 : i32, i32, i32
  }
  func.func @transform_10(%arg0: i32, %arg1: i32) -> (i32, i32, i32) {
    %c0_i32 = arith.constant 0 : i32
    %c0_i32_0 = arith.constant 0 : i32
    %c0_i32_1 = arith.constant 0 : i32
    return %arg0, %c0_i32, %c0_i32_0 : i32, i32, i32
  }
}

module attributes {stable_mosaic.version = 11 : i64} {
  func.func @_pass2_kernel(%arg0: i32, %arg1: memref<2xf32, #tpu.memory_space<smem>>, %arg2: memref<64x8xbf16, #tpu.memory_space<vmem>>, %arg3: memref<64x8xf32, #tpu.memory_space<vmem>>) attributes {dimension_semantics = [#tpu.dimension_semantics<parallel>], iteration_bounds = array<i64: 1>, scalar_prefetch = 0 : i64, scratch_operands = 0 : i64, tpu.core_type = #tpu.core_type<tc>, window_params = [{transform_indices = @transform_0, window_bounds = array<i64: 2>}, {transform_indices = @transform_1, window_bounds = array<i64: 64, 8>}, {transform_indices = @transform_2, window_bounds = array<i64: 64, 8>}]} {
    %c0 = arith.constant 0 : index
    %0 = memref.load %arg1[%c0] : memref<2xf32, #tpu.memory_space<smem>>
    %c1 = arith.constant 1 : index
    %1 = memref.load %arg1[%c1] : memref<2xf32, #tpu.memory_space<smem>>
    %c0_0 = arith.constant 0 : index
    %c0_1 = arith.constant 0 : index
    %2 = vector.load %arg2[%c0_0, %c0_1] : memref<64x8xbf16, #tpu.memory_space<vmem>>, vector<64x8xbf16>
    %3 = arith.extf %2 : vector<64x8xbf16> to vector<64x8xf32>
    %4 = vector.broadcast %0 : f32 to vector<64x8xf32>
    %5 = arith.subf %3, %4 : vector<64x8xf32>
    %6 = math.exp %5 : vector<64x8xf32>
    %7 = vector.broadcast %1 : f32 to vector<64x8xf32>
    %8 = arith.mulf %6, %7 : vector<64x8xf32>
    %c0_2 = arith.constant 0 : index
    %c0_3 = arith.constant 0 : index
    %9 = vector.load %arg3[%c0_2, %c0_3] : memref<64x8xf32, #tpu.memory_space<vmem>>, vector<64x8xf32>
    tpu.vector_store %arg3[%c0_2, %c0_3], %8 {strides = array<i32>} : memref<64x8xf32, #tpu.memory_space<vmem>>, vector<64x8xf32>,
    return
  }
  func.func @transform_0(%arg0: i32) -> i32 {
    %c0_i32 = arith.constant 0 : i32
    %c0_i32_0 = arith.constant 0 : i32
    return %c0_i32 : i32
  }
  func.func @transform_1(%arg0: i32) -> (i32, i32) {
    %c0_i32 = arith.constant 0 : i32
    %c0_i32_0 = arith.constant 0 : i32
    return %arg0, %c0_i32 : i32, i32
  }
  func.func @transform_2(%arg0: i32) -> (i32, i32) {
    %c0_i32 = arith.constant 0 : i32
    %c0_i32_0 = arith.constant 0 : i32
    return %arg0, %c0_i32 : i32, i32
  }
}

</mosaic_0001>

<bundles_post_ra>
// kernel: ffnn_forward.3
= control target key start
LH: loop header
LB: loop body
LE: loop exit
PB: predicated region body
PF: predicated region fallthrough
CT: control target
= control target key end

     0   :  { %7 = vsyncpa [#allocation3], 0  ;;  %s204_s0 = inlined_call_operand.vmem [shape: f32[2], index: 0, kind: input, shape index: {}]   ;;  %s205_s1 = inlined_call_operand.vmem [shape: bf16[64,8], index: 1, kind: input, shape index: {}]   ;;  %s206_s2 = inlined_call_operand.vmem [shape: f32[64,8], index: 2, kind: output, shape index: {}]  }
   0x1   :  { %s14_s11 = sshll.u32 %s204_s0, 4  ;;  %s15_s11 = int_to_ptr.vmem [resolvable:$true] %s14_s11 }
   0x2   :  { %s127_s12 = scalar_lea.vmem %s15_s11, 16  ;;  %p132_p1 = scmp.lt.s32.totalorder %s15_s11, %s15_s11 }
   0x3   :  { %p128_p0 = scmp.ne.s32.totalorder %s15_s11, %s127_s12  ;;  %p133_p2 = scmp.lt.s32.totalorder %s127_s12, %s127_s12 }
   0x5   :  { %p134_p3 = por %p133_p2, %p132_p1 }
   0x7   :  { %p135_p4 = pnand %p134_p3, %p128_p0 }
   0x9   :  { %138 = shalt.err (!%p135_p4)
}
   0xa   :  { %s141_s13 = smov [#allocation2]  }
   0xb   :  { %17 = dma.vmem_to_smem %s15_s11, 16, %s141_s13, [#allocation3]  }
   0xc   :  { %139 = dma.done.wait [#allocation3], 16  }
   0xd   :  { %140 = vsyncadd [#allocation3], 4294967280 }
   0xe   :  { %23 = sfence }
   0xf   :  { %s24_s14 = sld [smem:[#allocation2]]  ;;  %v92_v0 = vld [vmem:[%s205_s1] sm:$0xff]   ;;  %v107_v1 = vld [vmem:[%s205_s1 + $0x8] sm:$0xff]   ;;  %v108_v2 = vld [vmem:[%s205_s1 + $0x10] sm:$0xff]   ;;  %vm76_vm0 = vcmask 64512  }
  0x10   :  { %v109_v3 = vld [vmem:[%s205_s1 + $0x18] sm:$0xff]   ;;  %v93_v4 = vunpack.c.l.bf16 %v92_v0  ;;  %v94_v5 = vunpack.c.h.bf16 %v92_v0  ;;  %v97_v6 = vunpack.c.l.bf16 %v107_v1  ;;  %v98_v7 = vunpack.c.h.bf16 %v107_v1  ;;  %s90_s1 = sld [smem:[#allocation2 + $0x1]] }
  0x11   :  { %v101_v8 = vunpack.c.l.bf16 %v108_v2  ;;  %v102_v9 = vunpack.c.h.bf16 %v108_v2  ;;  %v105_v10 = vunpack.c.l.bf16 %v109_v3  ;;  %v106_v12 = vunpack.c.h.bf16 %v109_v3 }
  0x15   :  { %v42_v11 = vstv %s24_s14 }
  0x16   :  { %v43_v13 = vsub.f32 %v93_v4, %v42_v11  ;;  %v44_v14 = vsub.f32 %v94_v5, %v42_v11  ;;  %v45_v15 = vsub.f32 %v97_v6, %v42_v11  ;;  %v46_v16 = vsub.f32 %v98_v7, %v42_v11 }
  0x17   :  { %v47_v17 = vsub.f32 %v101_v8, %v42_v11  ;;  %v48_v18 = vsub.f32 %v102_v9, %v42_v11  ;;  %v49_v22 = vsub.f32 %v105_v10, %v42_v11  ;;  %v50_v24 = vsub.f32 %v106_v12, %v42_v11 }
  0x18   :  { %v51_v19 = vmul.f32 1.442695, %v43_v13  ;;  %v53_v20 = vmul.f32 1.442695, %v44_v14  ;;  %v55_v21 = vmul.f32 1.442695, %v45_v15  ;;  %v67_v29 = vstv %s90_s1 }
  0x19   :  { %v57_v23 = vmul.f32 1.442695, %v46_v16  ;;  %v59_v25 = vmul.f32 1.442695, %v47_v17  ;;  %v61_v26 = vmul.f32 1.442695, %v48_v18 }
  0x1a   :  { %111 = vpow2.f32 %v51_v19  ;;  %v63_v27 = vmul.f32 1.442695, %v49_v22  ;;  %v65_v28 = vmul.f32 1.442695, %v50_v24 }
  0x1b   :  { %113 = vpow2.f32 %v53_v20 }
  0x1c   :  { %115 = vpow2.f32 %v55_v21 }
  0x1d   :  { %117 = vpow2.f32 %v57_v23 }
  0x1e   :  { %119 = vpow2.f32 %v59_v25 }
  0x1f   :  { %121 = vpow2.f32 %v61_v26 }
  0x20   :  { %123 = vpow2.f32 %v63_v27 }
  0x21   :  { %125 = vpow2.f32 %v65_v28 }
  0x24   :  { %v112_v30 = vpop.eup %111 }
  0x25   :  { %v114_v31 = vpop.eup %113  ;;  %v68_v32 = vmul.f32 %v112_v30, %v67_v29 }
  0x26   :  { %v116_v33 = vpop.eup %115  ;;  %v69_v34 = vmul.f32 %v114_v31, %v67_v29 }
  0x27   :  { %v118_v35 = vpop.eup %117  ;;  %77 = vst.msk [vmem:[%s206_s2] sm:$0xff] %vm76_vm0, %v68_v32  ;;  %v70_v36 = vmul.f32 %v116_v33, %v67_v29 }
  0x28   :  { %v120_v37 = vpop.eup %119  ;;  %78 = vst.msk [vmem:[%s206_s2 + $0x8] sm:$0xff] %vm76_vm0, %v69_v34  ;;  %v71_v38 = vmul.f32 %v118_v35, %v67_v29 }
  0x29   :  { %v122_v39 = vpop.eup %121  ;;  %79 = vst.msk [vmem:[%s206_s2 + $0x10] sm:$0xff] %vm76_vm0, %v70_v36  ;;  %v72_v40 = vmul.f32 %v120_v37, %v67_v29 }
  0x2a   :  { %v124_v41 = vpop.eup %123  ;;  %80 = vst.msk [vmem:[%s206_s2 + $0x18] sm:$0xff] %vm76_vm0, %v71_v38  ;;  %v73_v42 = vmul.f32 %v122_v39, %v67_v29 }
  0x2b   :  { %v126_v43 = vpop.eup %125  ;;  %81 = vst.msk [vmem:[%s206_s2 + $0x20] sm:$0xff] %vm76_vm0, %v72_v40  ;;  %v74_v44 = vmul.f32 %v124_v41, %v67_v29 }
  0x2c   :  { %82 = vst.msk [vmem:[%s206_s2 + $0x28] sm:$0xff] %vm76_vm0, %v73_v42  ;;  %v75_v45 = vmul.f32 %v126_v43, %v67_v29 }
  0x2d   :  { %83 = vst.msk [vmem:[%s206_s2 + $0x30] sm:$0xff] %vm76_vm0, %v74_v44 }
  0x2e   :  { %84 = vst.msk [vmem:[%s206_s2 + $0x38] sm:$0xff] %vm76_vm0, %v75_v45 }
  0x2f   :  { %89 = vsyncpa [#allocation3], 1 }

// kernel: ffnn_forward.2
= control target key start
LH: loop header
LB: loop body
LE: loop exit
PB: predicated region body
PF: predicated region fallthrough
CT: control target
= control target key end

     0   :  { %16 = vsyncpa [#allocation5], 0  ;;  %s1919_s13 = smov 0   ;;  %s1921_s14 = smov 0   ;;  %s2112_s0 = inlined_call_operand.vmem [shape: f32[64,16], index: 0, kind: input, shape index: {}]   ;;  %s2113_s1 = inlined_call_operand.vmem [shape: s8[64,8], index: 1, kind: input, shape index: {}]   ;;  %s2114_s2 = inlined_call_operand.vmem [shape: bf16[16,128], index: 2, kind: input, shape index: {}]   ;;  %s2115_s3 = inlined_call_operand.vmem [shape: f32[1,128], index: 3, kind: input, shape index: {}]   ;;  %s2116_s4 = inlined_call_operand.hbm [shape: bf16[3,128,128], index: 4, kind: input, shape index: {}]   ;;  %s2117_s5 = inlined_call_operand.vmem [shape: f32[3,1,128], index: 5, kind: input, shape index: {}]   ;;  %s2118_s6 = inlined_call_operand.vmem [shape: bf16[128,8], index: 6, kind: input, shape index: {}]   ;;  %s2119_s7 = inlined_call_operand.vmem [shape: f32[1,8], index: 7, kind: input, shape index: {}]   ;;  %s2120_s8 = inlined_call_operand.vmem [shape: bf16[64,8], index: 8, kind: output, shape index: {0}]   ;;  %s2121_s9 = inlined_call_operand.vmem [shape: f32[2,8,128], index: 9, kind: output, shape index: {1}]   ;;  %s2122_s10 = inlined_call_operand.vmem [shape: f32[2,8,128], index: 10, kind: output, shape index: {2}]  }
   0x1   :  { %s1923_s15 = smov 0  }
   0x2 LB: > { %s1468_s16 = sadd.s32 4294967295, %s1856_s15   ;;  %s34_s17 = sadd.s32 1, %s1852_s14  ;;  %s1856_s15 = sphi %s1923_s15, %s22_s15   ;;  %s1852_s14 = sphi %s1921_s14, %s2140_s14   ;;  %s1848_s13 = sphi %s1919_s13, %s2139_s13  }
   0x3   : > { %p36_p0 = scmp.ge.s32.totalorder %s34_s17, 2  ;;  %p1470_p1 = scmp.ge.s32.totalorder %s1856_s15, 1 }
   0x4   : > { %p301_p2 = scmp.lt.s32.totalorder %s1856_s15, 3  ;;  %p1944_p4 = scmp.eq.s32.totalorder %s1468_s16, 0 }
   0x5   : > { %s2142_s17 = smov (%p36_p0, %s34_s17), 0  ;;  %s1858_s20 = smov [#allocation4]  }
   0x6   : > { %p1940_p3 = pnand %p1470_p1, %p301_p2  ;;  %s319_s21 = sshll.u32 %s1858_s20, 4  ;;  %s320_s21 = int_to_ptr.vmem [resolvable:$true] %s319_s21 }
   0x7   : > { %s2127_s19 = scalar_select %p1944_p4, 1, 0 }
   0x8   : > { %s2126_s18 = scalar_select %p1940_p3, 1, 0 }
   0x9   : > { %p1689_p5 = pneg %p1940_p3  ;;  %s1802_s25 = scalar_lea.hbm %s2116_s4, 3072 }
   0xa   : > { %p1803_p7 = scmp.ne.s32.totalorder %s2116_s4, %s1802_s25  ;;  %p1809_p11 = scmp.lt.u32.totalorder %s1802_s25, %s2116_s4 }
   0xb   : > { %p1952_p6 = pnand %p1944_p4, %p1689_p5 }
   0xd   : > { %p1804_p8 = pneg %p1952_p6 }
   0xf   : > { %p1805_p9 = pnand %p1804_p8, %p1803_p7 }
  0x11   : > { %p1806_p10 = pneg %p1805_p9 }
  0x13   : > { %p1811_p12 = pnand %p1809_p11, %p1806_p10 }
  0x15   : > { %1814 = shalt.err (!%p1811_p12)
}
  0x16   : > { %s1815_s30 = scalar_lea.vmem %s320_s21, 3072  ;;  %p1823_p2 = scmp.lt.s32.totalorder %s320_s21, %s320_s21 }
  0x17   : > { %p1816_p13 = scmp.ne.s32.totalorder %s320_s21, %s1815_s30  ;;  %p1824_p5 = scmp.lt.s32.totalorder %s1815_s30, %s1815_s30 }
  0x19   : > { %p1818_p0 = pnand %p1816_p13, %p1804_p8  ;;  %p1825_p4 = por %p1824_p5, %p1823_p2 }
  0x1b   : > { %p1819_p1 = pneg %p1818_p0 }
  0x1d   : > { %p1826_p3 = pnand %p1825_p4, %p1819_p1 }
  0x1f   : > { %1829 = shalt.err (!%p1826_p3)
}
  0x20   : > { %s1859_s11 = smov 64   ;;  %s1860_s12 = smov 4  }
  0x21   : > { %1692 = dma.hbm_to_vmem [thread:$0]  (!%p1952_p6), %s2116_s4, 3072, %s320_s21, [#allocation5], %s1859_s11, %s1859_s11, %s1860_s12  }
  0x22   : > { %p2129_p7 = scmp.ne.s32.totalorder %s2126_s18, 0 }
  0x23   : > { %p2130_p9 = scmp.ne.s32.totalorder (!%p2129_p7), %s2127_s19, 0 }
  0x24   : > { %364 = sbr.rel (%p2129_p7) target bundleno = 1955 (0x7a3), region = 52 }
  0x2b   : > { %1843 = dma.done.wait (%p2130_p9), [#allocation5], 3072  }
  0x2c   : > { %1845 = vsyncadd (%p2130_p9), [#allocation5], 4294964224  ;;  %s1475_s23 = sshll.u32 %s1848_s13, 2  ;;  %v1727_v0 = vld [vmem:[%s2114_s2] sm:$0xff]   ;;  %vm478_vm0 = vcmask 130048   ;;  %v1729_v8 = vld [vmem:[#allocation4 + $0x8] sm:$0xff]  }
  0x2d   : > { %p419_p3 = scmp.lt.s32.totalorder %s1475_s23, 7  ;;  %1595 = vmatprep.subr.bf16.mxu0 %v1727_v0  ;;  %v1728_v7 = vld [vmem:[#allocation4] sm:$0xff]   ;;  %v1730_v9 = vld [vmem:[#allocation4 + $0x10] sm:$0xff]   ;;  %v1731_v10 = vld [vmem:[#allocation4 + $0x18] sm:$0xff]   ;;  %p426_p4 = scmp.lt.s32.totalorder %s1848_s13, 1 }
  0x2e   : > { %1596 = vmatpush3.bf16.msra.mxu0 %v1727_v0  ;;  %1601 = vmatprep.subr.bf16.mxu1 %v1728_v7  ;;  %v1732_v11 = vld [vmem:[#allocation4 + $0x20] sm:$0xff]   ;;  %v1733_v12 = vld [vmem:[#allocation4 + $0x28] sm:$0xff]   ;;  %v1734_v13 = vld [vmem:[#allocation4 + $0x30] sm:$0xff]  }
  0x2f   : > { %s2144_s23 = smov (!%p419_p3, %s1475_s23), 7  ;;  %1602 = vmatpush3.bf16.msra.mxu1 %v1728_v7  ;;  %v1735_v14 = vld [vmem:[#allocation4 + $0x38] sm:$0xff]   ;;  %v1736_v15 = vld [vmem:[#allocation4 + $0x40] sm:$0xff]   ;;  %v1737_v55 = vld [vmem:[#allocation4 + $0x48] sm:$0xff]   ;;  %s2146_s13 = smov (!%p426_p4, %s1848_s13), 1 }
  0x30   : > { %s1476_s22 = sshll.u32 %s2144_s23, 3  ;;  %1603 = vmatprep.subr.bf16.mxu1 %v1729_v8  ;;  %1621 = vmatprep.subr.bf16.mxu0 %v1736_v15  ;;  %v1482_v16 = vld [vmem:[%s2115_s3] ss:$0 sm:$0xff]  ;;  %v1738_v56 = vld [vmem:[#allocation4 + $0x50] sm:$0xff]   ;;  %v1740_v58 = vld [vmem:[#allocation4 + $0x60] sm:$0xff]   ;;  %s1479_s18 = sshll.u32 %s2144_s23, 2 }
  0x31   : > { %s422_s21 = scalar_lea.vmem %s2112_s0, %s1476_s22  ;;  %v1739_v57 = vld [vmem:[#allocation4 + $0x58] sm:$0xff]   ;;  %v1741_v59 = vld [vmem:[#allocation4 + $0x68] sm:$0xff]   ;;  %v1742_v60 = vld [vmem:[#allocation4 + $0x70] sm:$0xff]   ;;  %s2026_s22 = sshll.u32 %s2146_s13, 3 }
  0x32   : > { %v457_v1 = vld [vmem:[%s422_s21] sm:$0xff]  ;;  %v458_v2 = vld [vmem:[%s422_s21 + $0x8] sm:$0xff]  ;;  %v459_v3 = vld [vmem:[%s422_s21 + $0x10] sm:$0xff]  ;;  %s436_s27 = scalar_lea.vmem %s2120_s8, %s1479_s18  ;;  %s442_s11 = scalar_lea.vmem %s2121_s9, %s2026_s22 }
  0x33   : > { %v461_v4 = vpack.c.bf16 %v458_v2, %v457_v1  ;;  %v460_v5 = vld [vmem:[%s422_s21 + $0x18] sm:$0xff]  ;;  %1604 = vmatpush3.bf16.msra.mxu1 %v1729_v8  ;;  %v1744_v62 = vld [vmem:[#allocation4 + $0x80] sm:$0xff]   ;;  %v1490_v63 = vld [vmem:[%s2117_s5] ss:$0 sm:$0xff]  ;;  %s429_s21 = scalar_lea.vmem %s2113_s1, %s2026_s22  ;;  %s446_s24 = scalar_lea.vmem %s2122_s10, %s2026_s22 }
  0x34   : > { %v462_v6 = vpack.c.bf16 %v460_v5, %v459_v3  ;;  %1605 = vmatprep.subr.bf16.mxu1 %v1730_v9  ;;  %v1743_v61 = vld [vmem:[#allocation4 + $0x78] sm:$0xff]  }
  0x35   : > { %1597 = vmatprep.mubr.msk.bf16.mxu0 %vm478_vm0, %v461_v4 }
  0x36   : > { %1598 = vmatmul.mubr.msk.bf16.vlgmr.msra.gmra.mrb[0].mxu0 %vm478_vm0, %v462_v6 }
  0x37   : > { %1606 = vmatpush3.bf16.msra.mxu1 %v1730_v9  ;;  %1622 = vmatpush3.bf16.msra.mxu0 %v1736_v15 }
  0x38   : > { %1607 = vmatprep.subr.bf16.mxu1 %v1731_v10  ;;  %1623 = vmatprep.subr.bf16.mxu0 %v1737_v55 }
  0x3b   : > { %1608 = vmatpush3.bf16.msra.mxu1 %v1731_v10  ;;  %1624 = vmatpush3.bf16.msra.mxu0 %v1737_v55 }
  0x3c   : > { %1609 = vmatprep.subr.bf16.mxu1 %v1732_v11  ;;  %1625 = vmatprep.subr.bf16.mxu0 %v1738_v56 }
  0x3f   : > { %1610 = vmatpush3.bf16.msra.mxu1 %v1732_v11  ;;  %1626 = vmatpush3.bf16.msra.mxu0 %v1738_v56 }
  0x40   : > { %1611 = vmatprep.subr.bf16.mxu1 %v1733_v12  ;;  %1627 = vmatprep.subr.bf16.mxu0 %v1739_v57 }
  0x43   : > { %1612 = vmatpush3.bf16.msra.mxu1 %v1733_v12  ;;  %1628 = vmatpush3.bf16.msra.mxu0 %v1739_v57 }
  0x44   : > { %1613 = vmatprep.subr.bf16.mxu1 %v1734_v13  ;;  %1629 = vmatprep.subr.bf16.mxu0 %v1740_v58 }
  0x47   : > { %1614 = vmatpush3.bf16.msra.mxu1 %v1734_v13  ;;  %1630 = vmatpush3.bf16.msra.mxu0 %v1740_v58 }
  0x48   : > { %1615 = vmatprep.subr.bf16.mxu1 %v1735_v14  ;;  %1631 = vmatprep.subr.bf16.mxu0 %v1741_v59 }
  0x4b   : > { %1616 = vmatpush3.bf16.msra.mxu1 %v1735_v14  ;;  %1632 = vmatpush3.bf16.msra.mxu0 %v1741_v59 }
  0x4c   : > { %1633 = vmatprep.subr.bf16.mxu0 %v1742_v60  ;;  %1641 = vmatprep.subr.bf16.mxu1 %v1744_v62 }
  0x4f   : > { %1634 = vmatpush3.bf16.msra.mxu0 %v1742_v60 }
  0x50   : > { %1635 = vmatprep.subr.bf16.mxu0 %v1743_v61 }
  0x53   : > { %1636 = vmatpush3.bf16.msra.mxu0 %v1743_v61 }
 0x109   : > { %v1599_v17 = vpop.f32.mrb[0].mxu0 }
 0x10a   : > { %v528_v18 = vadd.f32 %v1599_v17, %v1482_v16  ;;  %v519_v19 = vpop.f32.mrb[1].mxu0 }
 0x10b   : > { %v520_v20 = vadd.f32 %v1482_v16, %v519_v19  ;;  %v1600_v21 = vpop.f32.mrb[2].mxu0 }
 0x10c   : > { %v536_v22 = vmin.f32 %v528_v18, 0.0  ;;  %v531_v23 = vadd.f32 %v1600_v21, %v1482_v16  ;;  %v522_v24 = vpop.f32.mrb[3].mxu0  ;;  %vm548_vm1 = vcmp.gt.f32.partialorder %v528_v18, 0.0 }
 0x10d   : > { %v534_v25 = vmin.f32 %v520_v20, 0.0  ;;  %v523_v26 = vadd.f32 %v1482_v16, %v522_v24  ;;  %vm546_vm2 = vcmp.gt.f32.partialorder %v520_v20, 0.0 }
 0x10e   : > { %v542_v27 = vmul.f32 1.442695, %v536_v22  ;;  %v537_v28 = vmin.f32 %v531_v23, 0.0  ;;  %vm549_vm3 = vcmp.gt.f32.partialorder %v531_v23, 0.0 }
 0x10f   : > { %v538_v29 = vmul.f32 1.442695, %v534_v25  ;;  %v535_v30 = vmin.f32 %v523_v26, 0.0  ;;  %vm547_vm4 = vcmp.gt.f32.partialorder %v523_v26, 0.0 }
 0x110   : > { %1760 = vpow2.f32 %v542_v27  ;;  %v544_v31 = vmul.f32 1.442695, %v537_v28 }
 0x111   : > { %1762 = vpow2.f32 %v538_v29  ;;  %v540_v32 = vmul.f32 1.442695, %v535_v30 }
 0x112   : > { %1764 = vpow2.f32 %v544_v31 }
 0x113   : > { %1766 = vpow2.f32 %v540_v32 }
 0x11a   : > { %v1761_v33 = vpop.eup %1760 }
 0x11b   : > { %v1763_v34 = vpop.eup %1762  ;;  %v1488_v35 = vadd.f32 -1.0, %v1761_v33 }
 0x11c   : > { %v1765_v36 = vpop.eup %1764  ;;  %v1486_v37 = vadd.f32 -1.0, %v1763_v34 }
 0x11d   : > { %v1767_v38 = vpop.eup %1766  ;;  %v556_v39 = vmul.f32 1.6732632, %v1488_v35  ;;  %v1489_v40 = vadd.f32 -1.0, %v1765_v36 }
 0x11e   : > { %v1487_v41 = vadd.f32 -1.0, %v1767_v38  ;;  %v554_v42 = vmul.f32 1.6732632, %v1486_v37  ;;  %v1745_v38 = vld [vmem:[#allocation4 + $0x88] sm:$0xff]  }
 0x11f   : > { %v560_v43 = vsel %vm548_vm1, %v528_v18, %v556_v39  ;;  %v557_v44 = vmul.f32 1.6732632, %v1489_v40  ;;  %v1746_v39 = vld [vmem:[#allocation4 + $0x90] sm:$0xff]   ;;  %v1747_v40 = vld [vmem:[#allocation4 + $0x98] sm:$0xff]  }
 0x120   : > { %v555_v45 = vmul.f32 1.6732632, %v1487_v41  ;;  %v558_v46 = vsel %vm546_vm2, %v520_v20, %v554_v42  ;;  %v564_v48 = vmul.f32 1.050701, %v560_v43  ;;  %v1748_v41 = vld [vmem:[#allocation4 + $0xa0] sm:$0xff]   ;;  %v1749_v42 = vld [vmem:[#allocation4 + $0xa8] sm:$0xff]  }
 0x121   : > { %v561_v47 = vsel %vm549_vm3, %v531_v23, %v557_v44  ;;  %v562_v51 = vmul.f32 1.050701, %v558_v46  ;;  %v1750_v43 = vld [vmem:[#allocation4 + $0xb0] sm:$0xff]   ;;  %v1751_v44 = vld [vmem:[#allocation4 + $0xb8] sm:$0xff]  }
 0x122   : > { %v565_v49 = vmul.f32 1.050701, %v561_v47  ;;  %v559_v50 = vsel %vm547_vm4, %v523_v26, %v555_v45  ;;  %v1752_v45 = vld [vmem:[%s2118_s6] sm:$0xff]  }
 0x123   : > { %v563_v52 = vmul.f32 1.050701, %v559_v50  ;;  %1661 = vmatprep.subr.bf16.mxu0 %v1752_v45  ;;  %v1504_v46 = vld [vmem:[%s2117_s5 + $0x1] ss:$0 sm:$0xff] }
 0x124   : > { %v567_v53 = vpack.c.bf16 %v565_v49, %v564_v48 }
 0x125   : > { %v566_v54 = vpack.c.bf16 %v563_v52, %v562_v51 }
 0x127   : > { %1617 = vmatprep.mubr.bf16.mxu1 %v566_v54 }
 0x128   : > { %1618 = vmatmul.mubr.bf16.vlgmr.msra.gmra.mrb[0].mxu1 %v567_v53 }
 0x129   : > { %1642 = vmatpush3.bf16.msra.mxu1 %v1744_v62 }
 0x12a   : > { %1643 = vmatprep.subr.bf16.mxu1 %v1745_v38 }
 0x12d   : > { %1644 = vmatpush3.bf16.msra.mxu1 %v1745_v38 }
 0x12e   : > { %1645 = vmatprep.subr.bf16.mxu1 %v1746_v39 }
 0x131   : > { %1646 = vmatpush3.bf16.msra.mxu1 %v1746_v39 }
 0x132   : > { %1647 = vmatprep.subr.bf16.mxu1 %v1747_v40 }
 0x135   : > { %1648 = vmatpush3.bf16.msra.mxu1 %v1747_v40 }
 0x136   : > { %1649 = vmatprep.subr.bf16.mxu1 %v1748_v41 }
 0x139   : > { %1650 = vmatpush3.bf16.msra.mxu1 %v1748_v41 }
 0x13a   : > { %1651 = vmatprep.subr.bf16.mxu1 %v1749_v42 }
 0x13d   : > { %1652 = vmatpush3.bf16.msra.mxu1 %v1749_v42 }
 0x13e   : > { %1653 = vmatprep.subr.bf16.mxu1 %v1750_v43 }
 0x141   : > { %1654 = vmatpush3.bf16.msra.mxu1 %v1750_v43 }
 0x142   : > { %1655 = vmatprep.subr.bf16.mxu1 %v1751_v44 }
 0x145   : > { %1656 = vmatpush3.bf16.msra.mxu1 %v1751_v44 }
 0x1fb   : > { %v1619_v0 = vpop.f32.mrb[0].mxu1 }
 0x1fc   : > { %v682_v1 = vadd.f32 %v1619_v0, %v1490_v63  ;;  %v673_v2 = vpop.f32.mrb[1].mxu1 }
 0x1fd   : > { %v674_v3 = vadd.f32 %v1490_v63, %v673_v2  ;;  %v1620_v4 = vpop.f32.mrb[2].mxu1 }
 0x1fe   : > { %v690_v5 = vmin.f32 %v682_v1, 0.0  ;;  %v685_v6 = vadd.f32 %v1620_v4, %v1490_v63  ;;  %v676_v7 = vpop.f32.mrb[3].mxu1  ;;  %vm702_vm5 = vcmp.gt.f32.partialorder %v682_v1, 0.0 }
 0x1ff   : > { %v688_v8 = vmin.f32 %v674_v3, 0.0  ;;  %v677_v9 = vadd.f32 %v1490_v63, %v676_v7  ;;  %vm700_vm6 = vcmp.gt.f32.partialorder %v674_v3, 0.0 }
 0x200   : > { %v696_v10 = vmul.f32 1.442695, %v690_v5  ;;  %v691_v11 = vmin.f32 %v685_v6, 0.0  ;;  %vm703_vm7 = vcmp.gt.f32.partialorder %v685_v6, 0.0 }
 0x201   : > { %v692_v12 = vmul.f32 1.442695, %v688_v8  ;;  %v689_v13 = vmin.f32 %v677_v9, 0.0  ;;  %vm701_vm8 = vcmp.gt.f32.partialorder %v677_v9, 0.0 }
 0x202   : > { %1768 = vpow2.f32 %v696_v10  ;;  %v698_v14 = vmul.f32 1.442695, %v691_v11 }
 0x203   : > { %1770 = vpow2.f32 %v692_v12  ;;  %v694_v15 = vmul.f32 1.442695, %v689_v13 }
 0x204   : > { %1772 = vpow2.f32 %v698_v14 }
 0x205   : > { %1774 = vpow2.f32 %v694_v15 }
 0x20c   : > { %v1769_v16 = vpop.eup %1768 }
 0x20d   : > { %v1771_v17 = vpop.eup %1770  ;;  %v1501_v18 = vadd.f32 -1.0, %v1769_v16 }
 0x20e   : > { %v1773_v19 = vpop.eup %1772  ;;  %v1499_v20 = vadd.f32 -1.0, %v1771_v17 }
 0x20f   : > { %v1775_v21 = vpop.eup %1774  ;;  %v710_v22 = vmul.f32 1.6732632, %v1501_v18  ;;  %v1502_v23 = vadd.f32 -1.0, %v1773_v19 }
 0x210   : > { %v708_v24 = vmul.f32 1.6732632, %v1499_v20  ;;  %v1500_v25 = vadd.f32 -1.0, %v1775_v21  ;;  %v1753_v21 = vld [vmem:[%s2118_s6 + $0x8] sm:$0xff]  }
 0x211   : > { %v714_v26 = vsel %vm702_vm5, %v682_v1, %v710_v22  ;;  %v711_v27 = vmul.f32 1.6732632, %v1502_v23  ;;  %v1754_v22 = vld [vmem:[%s2118_s6 + $0x10] sm:$0xff]   ;;  %v1755_v23 = vld [vmem:[%s2118_s6 + $0x18] sm:$0xff]  }
 0x212   : > { %v712_v28 = vsel %vm700_vm6, %v674_v3, %v708_v24  ;;  %v709_v29 = vmul.f32 1.6732632, %v1500_v25  ;;  %v718_v31 = vmul.f32 1.050701, %v714_v26  ;;  %v1756_v24 = vld [vmem:[%s2118_s6 + $0x20] sm:$0xff]   ;;  %v1757_v25 = vld [vmem:[%s2118_s6 + $0x28] sm:$0xff]  }
 0x213   : > { %v715_v30 = vsel %vm703_vm7, %v685_v6, %v711_v27  ;;  %v716_v34 = vmul.f32 1.050701, %v712_v28  ;;  %v1758_v26 = vld [vmem:[%s2118_s6 + $0x30] sm:$0xff]   ;;  %v1759_v27 = vld [vmem:[%s2118_s6 + $0x38] sm:$0xff]   ;;  %v1518_v28 = vld [vmem:[%s2117_s5 + $0x2] ss:$0 sm:$0xff] }
 0x214   : > { %v719_v32 = vmul.f32 1.050701, %v715_v30  ;;  %v713_v33 = vsel %vm701_vm8, %v677_v9, %v709_v29 }
 0x215   : > { %v717_v35 = vmul.f32 1.050701, %v713_v33 }
 0x216   : > { %v721_v36 = vpack.c.bf16 %v719_v32, %v718_v31 }
 0x217   : > { %v720_v37 = vpack.c.bf16 %v717_v35, %v716_v34 }
 0x219   : > { %1637 = vmatprep.mubr.bf16.mxu0 %v720_v37 }
 0x21a   : > { %1638 = vmatmul.mubr.bf16.vlgmr.msra.gmra.mrb[4].mxu0 %v721_v36 }
 0x21b   : > { %1662 = vmatpush3.bf16.msra.mxu0 %v1752_v45 }
 0x21c   : > { %1663 = vmatprep.subr.bf16.mxu0 %v1753_v21 }
 0x21f   : > { %1664 = vmatpush3.bf16.msra.mxu0 %v1753_v21 }
 0x220   : > { %1665 = vmatprep.subr.bf16.mxu0 %v1754_v22 }
 0x223   : > { %1666 = vmatpush3.bf16.msra.mxu0 %v1754_v22 }
 0x224   : > { %1667 = vmatprep.subr.bf16.mxu0 %v1755_v23 }
 0x227   : > { %1668 = vmatpush3.bf16.msra.mxu0 %v1755_v23  ;;  %v1531_v23 = vld [vmem:[%s2119_s7] ss:$0 sm:$0xff] }
 0x228   : > { %1669 = vmatprep.subr.bf16.mxu0 %v1756_v24 }
 0x22b   : > { %1670 = vmatpush3.bf16.msra.mxu0 %v1756_v24 }
 0x22c   : > { %1671 = vmatprep.subr.bf16.mxu0 %v1757_v25 }
 0x22f   : > { %1672 = vmatpush3.bf16.msra.mxu0 %v1757_v25 }
 0x230   : > { %1673 = vmatprep.subr.bf16.mxu0 %v1758_v26 }
 0x233   : > { %1674 = vmatpush3.bf16.msra.mxu0 %v1758_v26 }
 0x234   : > { %1675 = vmatprep.subr.bf16.mxu0 %v1759_v27 }
 0x237   : > { %1676 = vmatpush3.bf16.msra.mxu0 %v1759_v27 }
 0x2ed   : > { %v1639_v47 = vpop.f32.mrb[4].mxu0 }
 0x2ee   : > { %v838_v48 = vadd.f32 %v1639_v47, %v1504_v46  ;;  %v829_v49 = vpop.f32.mrb[5].mxu0 }
 0x2ef   : > { %v830_v50 = vadd.f32 %v1504_v46, %v829_v49  ;;  %v1640_v51 = vpop.f32.mrb[6].mxu0 }
 0x2f0   : > { %v846_v52 = vmin.f32 %v838_v48, 0.0  ;;  %v841_v53 = vadd.f32 %v1640_v51, %v1504_v46  ;;  %v832_v54 = vpop.f32.mrb[7].mxu0  ;;  %vm858_vm9 = vcmp.gt.f32.partialorder %v838_v48, 0.0 }
 0x2f1   : > { %v844_v55 = vmin.f32 %v830_v50, 0.0  ;;  %v833_v56 = vadd.f32 %v1504_v46, %v832_v54  ;;  %vm856_vm10 = vcmp.gt.f32.partialorder %v830_v50, 0.0 }
 0x2f2   : > { %v852_v57 = vmul.f32 1.442695, %v846_v52  ;;  %v847_v58 = vmin.f32 %v841_v53, 0.0  ;;  %vm859_vm11 = vcmp.gt.f32.partialorder %v841_v53, 0.0 }
 0x2f3   : > { %v848_v59 = vmul.f32 1.442695, %v844_v55  ;;  %v845_v60 = vmin.f32 %v833_v56, 0.0  ;;  %vm857_vm12 = vcmp.gt.f32.partialorder %v833_v56, 0.0 }
 0x2f4   : > { %1776 = vpow2.f32 %v852_v57  ;;  %v854_v61 = vmul.f32 1.442695, %v847_v58 }
 0x2f5   : > { %1778 = vpow2.f32 %v848_v59  ;;  %v850_v62 = vmul.f32 1.442695, %v845_v60 }
 0x2f6   : > { %1780 = vpow2.f32 %v854_v61 }
 0x2f7   : > { %1782 = vpow2.f32 %v850_v62 }
 0x2fe   : > { %v1777_v63 = vpop.eup %1776 }
 0x2ff   : > { %v1779_v0 = vpop.eup %1778  ;;  %v1515_v1 = vadd.f32 -1.0, %v1777_v63 }
 0x300   : > { %v1781_v2 = vpop.eup %1780  ;;  %v1513_v3 = vadd.f32 -1.0, %v1779_v0 }
 0x301   : > { %v1783_v4 = vpop.eup %1782  ;;  %v866_v5 = vmul.f32 1.6732632, %v1515_v1  ;;  %v1516_v6 = vadd.f32 -1.0, %v1781_v2 }
 0x302   : > { %v864_v7 = vmul.f32 1.6732632, %v1513_v3  ;;  %v1514_v8 = vadd.f32 -1.0, %v1783_v4  ;;  %v1861_v3 = vmov 0   ;;  %v1154_v4 = vld [vmem:[%s429_s21] sm:$0xff] }
 0x303   : > { %v870_v9 = vsel %vm858_vm9, %v838_v48, %v866_v5  ;;  %v867_v10 = vmul.f32 1.6732632, %v1516_v6  ;;  %1725 = vset.pattern.permute.xlu0 %v1861_v3  ;;  %1726 = vset.pattern.permute.xlu1 %v1861_v3  ;;  %vm1155_vm1 = vnez %v1154_v4 }
 0x304   : > { %v868_v11 = vsel %vm856_vm10, %v830_v50, %v864_v7  ;;  %v865_v12 = vmul.f32 1.6732632, %v1514_v8  ;;  %v874_v14 = vmul.f32 1.050701, %v870_v9  ;;  %v1156_v5 = vsel %vm1155_vm1, 16843009, %v1861_v3 }
 0x305   : > { %v871_v13 = vsel %vm859_vm11, %v841_v53, %v867_v10  ;;  %v872_v17 = vmul.f32 1.050701, %v868_v11  ;;  %v1157_v6 = vunpack.c.0.s8 %v1156_v5  ;;  %v1159_v7 = vunpack.c.2.s8 %v1156_v5 }
 0x306   : > { %v875_v15 = vmul.f32 1.050701, %v871_v13  ;;  %v869_v16 = vsel %vm857_vm12, %v833_v56, %v865_v12  ;;  %v1160_v8 = vunpack.c.3.s8 %v1156_v5  ;;  %v1158_v9 = vunpack.c.1.s8 %v1156_v5 }
 0x307   : > { %v873_v18 = vmul.f32 1.050701, %v869_v16  ;;  %v1161_v10 = vpack.c.b16 %v1157_v6, %v1157_v6  ;;  %v1165_v11 = vpack.c.b16 %v1159_v7, %v1159_v7  ;;  %vm1205_vm10 = vcmask 60416  }
 0x308   : > { %v877_v19 = vpack.c.bf16 %v875_v15, %v874_v14  ;;  %v1167_v12 = vpack.c.b16 %v1160_v8, %v1160_v8  ;;  %v1163_v13 = vpack.c.b16 %v1158_v9, %v1158_v9  ;;  %vm1218_vm11 = vcmask 64512  }
 0x309   : > { %v876_v20 = vpack.c.bf16 %v873_v18, %v872_v17  ;;  %v1162_v14 = vpack.c.b8 %v1161_v10, %v1161_v10  ;;  %v1166_v15 = vpack.c.b8 %v1165_v11, %v1165_v11  ;;  %vm454_vm12 = vcmask 0  }
 0x30a   : > { %v1168_v16 = vpack.c.b8 %v1167_v12, %v1167_v12  ;;  %v1164_v17 = vpack.c.b8 %v1163_v13, %v1163_v13  ;;  %v1239_v9 = vlaneseq }
 0x30b   : > { %1657 = vmatprep.mubr.bf16.mxu1 %v876_v20  ;;  %vm1169_vm2 = vnez %v1162_v14  ;;  %vm1171_vm3 = vnez %v1166_v15 }
 0x30c   : > { %1658 = vmatmul.mubr.bf16.vlgmr.msra.gmra.mrb[4].mxu1 %v877_v19  ;;  %vm1172_vm4 = vnez %v1168_v16  ;;  %vm1170_vm5 = vnez %v1164_v17  ;;  %v1173_v18 = vsel %vm1169_vm2, 16843009, %v1861_v3  ;;  %v1175_v19 = vsel %vm1171_vm3, 16843009, %v1861_v3 }
 0x30d   : > { %v1176_v20 = vsel %vm1172_vm4, 16843009, %v1861_v3  ;;  %v1174_v21 = vsel %vm1170_vm5, 16843009, %v1861_v3  ;;  %v1177_v22 = vunpack.c.0.s8 %v1173_v18  ;;  %v1179_v24 = vunpack.c.0.s8 %v1175_v19 }
 0x30e   : > { %v1180_v25 = vunpack.c.0.s8 %v1176_v20  ;;  %v1178_v26 = vunpack.c.0.s8 %v1174_v21  ;;  %v1240_v10 = vshrl.u32 %v1239_v9, 7 }
 0x30f   : > { %vm2036_vm6 = vcmp.ne.s32.totalorder %v1177_v22, 0  ;;  %vm2040_vm7 = vcmp.ne.s32.totalorder %v1179_v24, 0 }
 0x310   : > { %vm2044_vm8 = vcmp.ne.s32.totalorder %v1180_v25, 0  ;;  %vm2048_vm9 = vcmp.ne.s32.totalorder %v1178_v26, 0  ;;  %v1241_v12 = vsub.s32 0, %v1240_v10 }
 0x3df   : > { %v1659_v29 = vpop.f32.mrb[4].mxu1 }
 0x3e0   : > { %v994_v30 = vadd.f32 %v1659_v29, %v1518_v28  ;;  %v985_v31 = vpop.f32.mrb[5].mxu1 }
 0x3e1   : > { %v986_v32 = vadd.f32 %v1518_v28, %v985_v31  ;;  %v1660_v33 = vpop.f32.mrb[6].mxu1 }
 0x3e2   : > { %v1002_v34 = vmin.f32 %v994_v30, 0.0  ;;  %v997_v35 = vadd.f32 %v1660_v33, %v1518_v28  ;;  %v988_v36 = vpop.f32.mrb[7].mxu1  ;;  %vm1014_vm13 = vcmp.gt.f32.partialorder %v994_v30, 0.0 }
 0x3e3   : > { %v1000_v37 = vmin.f32 %v986_v32, 0.0  ;;  %v989_v38 = vadd.f32 %v1518_v28, %v988_v36  ;;  %vm1012_vm14 = vcmp.gt.f32.partialorder %v986_v32, 0.0 }
 0x3e4   : > { %v1008_v39 = vmul.f32 1.442695, %v1002_v34  ;;  %v1003_v40 = vmin.f32 %v997_v35, 0.0  ;;  %vm1015_vm15 = vcmp.gt.f32.partialorder %v997_v35, 0.0 }
 0x3e5   : > { %v1004_v41 = vmul.f32 1.442695, %v1000_v37  ;;  %v1001_v42 = vmin.f32 %v989_v38, 0.0  ;;  %vm1013_vm0 = vcmp.gt.f32.partialorder %v989_v38, 0.0 }
 0x3e6   : > { %1784 = vpow2.f32 %v1008_v39  ;;  %v1010_v43 = vmul.f32 1.442695, %v1003_v40 }
 0x3e7   : > { %1786 = vpow2.f32 %v1004_v41  ;;  %v1006_v44 = vmul.f32 1.442695, %v1001_v42 }
 0x3e8   : > { %1788 = vpow2.f32 %v1010_v43 }
 0x3e9   : > { %1790 = vpow2.f32 %v1006_v44 }
 0x3f0   : > { %v1785_v45 = vpop.eup %1784 }
 0x3f1   : > { %v1787_v46 = vpop.eup %1786  ;;  %v1529_v47 = vadd.f32 -1.0, %v1785_v45 }
 0x3f2   : > { %v1789_v48 = vpop.eup %1788  ;;  %v1527_v49 = vadd.f32 -1.0, %v1787_v46 }
 0x3f3   : > { %v1791_v50 = vpop.eup %1790  ;;  %v1022_v51 = vmul.f32 1.6732632, %v1529_v47  ;;  %v1530_v52 = vadd.f32 -1.0, %v1789_v48 }
 0x3f4   : > { %v1020_v53 = vmul.f32 1.6732632, %v1527_v49  ;;  %v1528_v54 = vadd.f32 -1.0, %v1791_v50 }
 0x3f5   : > { %v1026_v55 = vsel %vm1014_vm13, %v994_v30, %v1022_v51  ;;  %v1023_v56 = vmul.f32 1.6732632, %v1530_v52 }
 0x3f6   : > { %v1024_v57 = vsel %vm1012_vm14, %v986_v32, %v1020_v53  ;;  %v1021_v58 = vmul.f32 1.6732632, %v1528_v54  ;;  %v1030_v60 = vmul.f32 1.050701, %v1026_v55 }
 0x3f7   : > { %v1027_v59 = vsel %vm1015_vm15, %v997_v35, %v1023_v56  ;;  %v1028_v63 = vmul.f32 1.050701, %v1024_v57 }
 0x3f8   : > { %v1031_v61 = vmul.f32 1.050701, %v1027_v59  ;;  %v1025_v62 = vsel %vm1013_vm0, %v989_v38, %v1021_v58 }
 0x3f9   : > { %v1029_v0 = vmul.f32 1.050701, %v1025_v62 }
 0x3fa   : > { %v1033_v1 = vpack.c.bf16 %v1031_v61, %v1030_v60 }
 0x3fb   : > { %v1032_v2 = vpack.c.bf16 %v1029_v0, %v1028_v63  ;;  %v1862_v0 = vmov -1e+30  }
 0x3fc   : > { %455 = vst.msk [vmem:[#allocation2] sm:$0x1] %vm454_vm12, %v1862_v0 }
 0x3fd   : > { %1677 = vmatprep.mubr.bf16.mxu0 %v1032_v2 }
 0x3fe   : > { %1678 = vmatmul.mubr.bf16.vlgmr.msra.gmra.mrb[8].mxu0 %v1033_v1  ;;  %v1863_v1 = vmov 0.0  }
 0x3ff   : > { %456 = vst.msk [vmem:[#allocation3] sm:$0x1] %vm454_vm12, %v1863_v1 }
 0x403   : > { %v1236_v11 = vld [vmem:[#allocation2] sm:$0x1] }
 0x4d1   : > { %v1679_v27 = vpop.f32.mrb[8].mxu0 }
 0x4d2   : > { %v1148_v28 = vadd.f32 %v1679_v27, %v1531_v23  ;;  %v1139_v29 = vpop.f32.mrb[9].mxu0 }
 0x4d3   : > { %v1140_v32 = vadd.f32 %v1531_v23, %v1139_v29  ;;  %v1680_v33 = vpop.f32.mrb[10].mxu0 }
 0x4d4   : > { %v1151_v35 = vadd.f32 %v1680_v33, %v1531_v23  ;;  %v1142_v36 = vpop.f32.mrb[11].mxu0  ;;  %v1187_v40 = vsel %vm2040_vm7, %v1148_v28, -inf }
 0x4d5   : > { %v1185_v38 = vsel %vm2036_vm6, %v1140_v32, -inf  ;;  %v1143_v39 = vadd.f32 %v1531_v23, %v1142_v36  ;;  %v1550_v47 = vpack.c.bf16 %v1187_v40, %v1187_v40 }
 0x4d6   : > { %v1548_v41 = vpack.c.bf16 %v1185_v38, %v1185_v38  ;;  %v1188_v42 = vsel %vm2044_vm8, %v1151_v35, -inf }
 0x4d7   : > { %v1190_v43 = vpack.c.bf16 %v1188_v42, %v1187_v40  ;;  %v1186_v44 = vsel %vm2048_vm9, %v1143_v39, -inf  ;;  %v1551_v50 = vpack.c.bf16 %v1188_v42, %v1188_v42  ;;  %1208 = vst.msk [vmem:[%s436_s27 + $0x8] sm:$0xf] %vm1205_vm10, %v1550_v47 }
 0x4d8   : > { %1206 = vst.msk [vmem:[%s436_s27] sm:$0xf] %vm1205_vm10, %v1548_v41  ;;  %v1189_v45 = vpack.c.bf16 %v1186_v44, %v1185_v38  ;;  %v1549_v46 = vpack.c.bf16 %v1186_v44, %v1186_v44 }
 0x4d9   : > { %v1212_v48 = vunpack.c.l.bf16 %v1190_v43  ;;  %v1213_v49 = vunpack.c.h.bf16 %v1190_v43  ;;  %1209 = vst.msk [vmem:[%s436_s27 + $0xc] sm:$0xf] %vm1205_vm10, %v1551_v50 }
 0x4da   : > { %1207 = vst.msk [vmem:[%s436_s27 + $0x4] sm:$0xf] %vm1205_vm10, %v1549_v46  ;;  %v1210_v51 = vunpack.c.l.bf16 %v1189_v45  ;;  %v1211_v52 = vunpack.c.h.bf16 %v1189_v45 }
 0x4db   : > { %v1216_v53 = vsel %vm2040_vm7, %v1212_v48, -1e+30  ;;  %v1217_v54 = vsel %vm2044_vm8, %v1213_v49, -1e+30 }
 0x4dc   : > { %v1214_v55 = vsel %vm2036_vm6, %v1210_v51, -1e+30  ;;  %v1215_v56 = vsel %vm2048_vm9, %v1211_v52, -1e+30  ;;  %v1221_v57 = vsel %vm1218_vm11, %v1216_v53, -inf  ;;  %v1222_v58 = vsel %vm1218_vm11, %v1217_v54, -inf }
 0x4dd   : > { %v1219_v59 = vsel %vm1218_vm11, %v1214_v55, -inf  ;;  %v1220_v60 = vsel %vm1218_vm11, %v1215_v56, -inf  ;;  %v1224_v61 = vmax.f32 %v1221_v57, %v1222_v58  ;;  %v1280_v52 = vld [vmem:[#allocation3] sm:$0x1] }
 0x4de   : > { %v1223_v62 = vmax.f32 %v1219_v59, %v1220_v60 }
 0x4e0   : > { %v1225_v63 = vmax.f32 %v1223_v62, %v1224_v61 }
 0x4e2   : > { %1226 = vmax.xlane.f32.xlu0 %v1225_v63 }
 0x56f   : > { %v1227_v2 = vpop.xlane.xlu0 %1226 }
 0x570   : > { %v1228_v3 = vrot.slane %v1227_v2, 4 }
 0x572   : > { %v1229_v4 = vmax.f32 %v1227_v2, %v1228_v3 }
 0x574   : > { %v1230_v5 = vrot.slane %v1229_v4, 2 }
 0x576   : > { %v1231_v6 = vmax.f32 %v1229_v4, %v1230_v5 }
 0x578   : > { %v1232_v7 = vrot.slane %v1231_v6, 1 }
 0x57a   : > { %v1233_v8 = vmax.f32 %v1231_v6, %v1232_v7 }
 0x57c   : > { %1681 = vpush %v1233_v8 }
 0x5ad   : > { %s1682_s28 = spop %1681 }
 0x5ae   : > { %v1235_v13 = vstv %s1682_s28 }
 0x5af   : > { %v1237_v14 = vmax.f32 %v1236_v11, %v1235_v13 }
 0x5b1   : > { %v1281_v15 = vsub.f32 %v1236_v11, %v1237_v14  ;;  %1288 = vst.msk [vmem:[#allocation2] sm:$0x1] %vm454_vm12, %v1237_v14  ;;  %v1242_v16 = vrot.slane %v1237_v14, %v1241_v12 }
 0x5b3   : > { %1244 = vperm.xlu0 %1725, %v1242_v16   ;;  %v1282_v50 = vmul.f32 1.442695, %v1281_v15 }
 0x5b8   : > { %v1544_v43 = vld [vmem:[#allocation2] ss:$0 sm:$0xff] }
 0x632   : > { %v1245_v17 = vpop.permute.xlu0 %1244 }
 0x633   : > { %v1247_v18 = vsub.f32 %v1214_v55, %v1245_v17  ;;  %v1248_v19 = vsub.f32 %v1215_v56, %v1245_v17  ;;  %v1249_v20 = vsub.f32 %v1216_v53, %v1245_v17  ;;  %v1250_v21 = vsub.f32 %v1217_v54, %v1245_v17 }
 0x635   : > { %v1251_v22 = vmul.f32 1.442695, %v1247_v18  ;;  %v1253_v23 = vmul.f32 1.442695, %v1248_v19  ;;  %v1255_v24 = vmul.f32 1.442695, %v1249_v20 }
 0x636   : > { %v1257_v25 = vmul.f32 1.442695, %v1250_v21 }
 0x637   : > { %1792 = vpow2.f32 %v1251_v22 }
 0x638   : > { %1794 = vpow2.f32 %v1253_v23 }
 0x639   : > { %1796 = vpow2.f32 %v1255_v24 }
 0x63a   : > { %1798 = vpow2.f32 %v1257_v25 }
 0x63b   : > { %1800 = vpow2.f32 %v1282_v50 }
 0x641   : > { %v1793_v26 = vpop.eup %1792 }
 0x642   : > { %v1795_v27 = vpop.eup %1794  ;;  %v1259_v28 = vsel %vm2036_vm6, %v1793_v26, 0.0 }
 0x643   : > { %v1797_v29 = vpop.eup %1796  ;;  %v1260_v32 = vsel %vm2048_vm9, %v1795_v27, 0.0  ;;  %v1263_v33 = vsel %vm1218_vm11, %v1259_v28, 0.0 }
 0x644   : > { %v1799_v35 = vpop.eup %1798  ;;  %v1261_v36 = vsel %vm2040_vm7, %v1797_v29, 0.0  ;;  %v1264_v38 = vsel %vm1218_vm11, %v1260_v32, 0.0 }
 0x645   : > { %v1262_v39 = vsel %vm2044_vm8, %v1799_v35, 0.0  ;;  %v1265_v40 = vadd.f32 %v1264_v38, %v1263_v33  ;;  %v1266_v30 = vsel %vm1218_vm11, %v1261_v36, 0.0  ;;  %v1801_v51 = vpop.eup %1800 }
 0x646   : > { %v1268_v42 = vsel %vm1218_vm11, %v1262_v39, 0.0  ;;  %v1284_v53 = vmul.f32 %v1801_v51, %v1280_v52 }
 0x647   : > { %v1267_v41 = vadd.f32 %v1266_v30, %v1265_v40 }
 0x649   : > { %v1269_v37 = vadd.f32 %v1268_v42, %v1267_v41 }
 0x64b   : > { %1270 = vadd.xlane.f32.xlu1 %v1269_v37 }
 0x65c   : > { %1299 = vperm.xlu1 %1726, %v1544_v43  }
 0x6d8   : > { %v1271_v44 = vpop.xlane.xlu1 %1270 }
 0x6d9   : > { %v1272_v45 = vrot.slane %v1271_v44, 4 }
 0x6db   : > { %v1273_v31 = vadd.f32 %v1272_v45, %v1271_v44 }
 0x6dc   : > { %v1300_v46 = vpop.permute.xlu1 %1299 }
 0x6dd   : > { %v1274_v34 = vrot.slane %v1273_v31, 2  ;;  %1302 = vst [vmem:[%s442_s11] sm:$0xff] %v1300_v46 }
 0x6df   : > { %v1275_v47 = vadd.f32 %v1274_v34, %v1273_v31 }
 0x6e1   : > { %v1276_v48 = vrot.slane %v1275_v47, 1 }
 0x6e3   : > { %v1277_v49 = vadd.f32 %v1276_v48, %v1275_v47 }
 0x6e5   : > { %1683 = vpush %v1277_v49 }
 0x716   : > { %s1684_s12 = spop %1683 }
 0x717   : > { %v1279_v54 = vstv %s1684_s12 }
 0x718   : > { %v1285_v55 = vadd.f32 %v1284_v53, %v1279_v54 }
 0x71a   : > { %1287 = vst.msk [vmem:[#allocation3] sm:$0x1] %vm454_vm12, %v1285_v55 }
 0x721   : > { %v1545_v56 = vld [vmem:[#allocation3] ss:$0 sm:$0xff] }
 0x722   : > { %1310 = vperm.xlu1 %1726, %v1545_v56  }
 0x7a1   : > { %v1311_v57 = vpop.permute.xlu1 %1310 }
 0x7a2   : > { %1313 = vst [vmem:[%s446_s24] sm:$0xff] %v1311_v57 }
 0x7a3 PF: > { %s22_s15 = sadd.s32 1, %s1856_s15   ;;  %s2139_s13 = smov %s1852_s14 }
 0x7a4   : > { %p19_p6 = scmp.ge.s32.totalorder %s22_s15, 4   ;;  %s2140_s14 = smov %s2142_s17 }
 0x7a6   :  { %21 = sbr.rel (!%p19_p6) target bundleno = 2 (0x2), region = 126 }
 0x7ad   :  { %1367 = vsyncpa [#allocation5], 1 }
 0x7ae   :  { %1369 = vsyncpa [#allocation5 + $0x1], 1 }

</bundles_post_ra>
